<compile_context>
chip_gen: v7x
topology: tpu7x:2x2x1
jax: 0.10.0
libtpu: 0.0.40
codegen_flags: <defaults>
</compile_context>

<pallas_src>
import jax
import jax.numpy as jnp
from jax.experimental import pallas as pl
from jax.experimental.pallas import tpu as pltpu

B = 2                    # batch
L = 186                  # input length -> conv 182 -> pool 91 -> 16*91 = 1456
K = 5                    # conv kernel size
C_OUT = 16               # conv out channels
L_CONV = L - K + 1       # 182
L_POOL = L_CONV // 2     # 91
L_HALF = L // 2          # 93 even / odd samples each
NUM_CLASSES = 5
FLAT = C_OUT * L_POOL    # 1456
LANES = 128              # TPU lane width: spatial & class dims are padded to it
IN_ROWS = 8              # 6 shifted signal rows, padded to a sublane multiple


def _simple_cnn_kernel(x_ref, wt_ref, bc_ref, wfc_ref, bfc_ref, out_ref, pooled_ref):
    """Fused Conv1d(1->16,k=5) + ReLU + MaxPool1d(2) + Linear(1456->5 padded to 128).

    x_ref:      (B, 8, 128)    rows 0..5 = [xe, xo, xe+1, xo+1, xe+2, xo+2]
                               (lane p = spatial position, zero padded 93->128)
    wt_ref:     (5, 16, 128)   conv tap k broadcast over lanes: wt[k, co, :] = w[co, 0, k]
    bc_ref:     (16, 128)      conv bias broadcast over lanes
    wfc_ref:    (16, 128, 128) fc weight: wfc[co, p, n] = fc_w[n, co*91+p] (zero padded)
    bfc_ref:    (1, 128)       fc bias (zero padded)
    out_ref:    (B, 128)       logits (columns >= 5 are zero)
    pooled_ref: (B, 16, 128)   VMEM scratch holding pooled activations
    """
    xe0 = x_ref[:, 0:1, :]    # x[2p]     (B, 1, 128)
    xo0 = x_ref[:, 1:2, :]    # x[2p + 1]
    xe1 = x_ref[:, 2:3, :]    # x[2p + 2]
    xo1 = x_ref[:, 3:4, :]    # x[2p + 3]
    xe2 = x_ref[:, 4:5, :]    # x[2p + 4]
    xo2 = x_ref[:, 5:6, :]    # x[2p + 5]

    w0 = wt_ref[0]; w1 = wt_ref[1]; w2 = wt_ref[2]; w3 = wt_ref[3]; w4 = wt_ref[4]
    bias = bc_ref[...]        # (16, 128)

    # Conv at even / odd output positions, broadcast over channels -> (B, 16, 128)
    even = xe0 * w0 + xo0 * w1 + xe1 * w2 + xo1 * w3 + xe2 * w4 + bias
    odd = xo0 * w0 + xe1 * w1 + xo1 * w2 + xe2 * w3 + xo2 * w4 + bias
    # max(relu(even), relu(odd)) == relu(max(even, odd)); lanes >= 91 are junk
    # but hit only zero rows of the padded FC weight.
    pooled_ref[...] = jnp.maximum(jnp.maximum(even, odd), 0.0)

    # FC: contract (16 channels x 128 padded positions) against padded weights.
    batch = out_ref.shape[0]
    acc = jnp.zeros((batch, LANES), jnp.float32)
    for co in range(C_OUT):
        acc = acc + jnp.dot(pooled_ref[:, co, :], wfc_ref[co],
                            preferred_element_type=jnp.float32)
    out_ref[...] = acc + bfc_ref[...]


def _fused_call(x6, w_taps, b_conv, w_fc_p, b_fc_p):
    batch = x6.shape[0]
    return pl.pallas_call(
        _simple_cnn_kernel,
        out_shape=jax.ShapeDtypeStruct((batch, LANES), jnp.float32),
        grid=(1,),
        in_specs=[
            pl.BlockSpec((batch, IN_ROWS, LANES), lambda i: (0, 0, 0)),
            pl.BlockSpec((K, C_OUT, LANES), lambda i: (0, 0, 0)),
            pl.BlockSpec((C_OUT, LANES), lambda i: (0, 0)),
            pl.BlockSpec((C_OUT, LANES, LANES), lambda i: (0, 0, 0)),
            pl.BlockSpec((1, LANES), lambda i: (0, 0)),
        ],
        out_specs=pl.BlockSpec((batch, LANES), lambda i: (0, 0)),
        scratch_shapes=[pltpu.VMEM((batch, C_OUT, LANES), jnp.float32)],
        compiler_params=pltpu.CompilerParams(dimension_semantics=("arbitrary",)),
    )(x6, w_taps, b_conv, w_fc_p, b_fc_p)


def prepare_params(conv_w, conv_b, fc_w, fc_b):
    """One-time weight re-layout / padding (amortized outside the forward path)."""
    # (5, 16, 128): tap k for channel co, broadcast across lanes.
    w_taps = jnp.broadcast_to(
        jnp.transpose(conv_w[:, 0, :], (1, 0))[:, :, None], (K, C_OUT, LANES)
    ).astype(jnp.float32)
    b_conv = jnp.broadcast_to(conv_b[:, None], (C_OUT, LANES)).astype(jnp.float32)
    # PyTorch flatten index is co*91 + p -> (16, 91, 5), then zero-pad to (16,128,128).
    w_fc_p = jnp.transpose(fc_w, (1, 0)).reshape(C_OUT, L_POOL, NUM_CLASSES)
    w_fc_p = jnp.pad(w_fc_p, ((0, 0), (0, LANES - L_POOL), (0, LANES - NUM_CLASSES)))
    b_fc_p = jnp.pad(fc_b, (0, LANES - NUM_CLASSES))[None, :]
    return w_taps, b_conv, w_fc_p.astype(jnp.float32), b_fc_p.astype(jnp.float32)


@jax.jit
def simple_cnn_forward(x, w_taps, b_conv, w_fc_p, b_fc_p):
    """x: (B, 1, L) float32, NCL like PyTorch. Params from prepare_params()."""
    xs = x[:, 0, :]          # (B, 186)
    xe = xs[:, 0::2]         # (B, 93) even samples
    xo = xs[:, 1::2]         # (B, 93) odd samples

    def shifted(a, s):       # (B, 93) -> (B, 128): out[:, p] = a[:, p + s], zero padded
        return jnp.pad(a[:, s:], ((0, 0), (0, LANES - (L_HALF - s))))

    rows = [shifted(xe, 0), shifted(xo, 0), shifted(xe, 1),
            shifted(xo, 1), shifted(xe, 2), shifted(xo, 2)]
    x6 = jnp.stack(rows, axis=1)                            # (B, 6, 128)
    x6 = jnp.pad(x6, ((0, 0), (0, IN_ROWS - 6), (0, 0)))    # (B, 8, 128)
    logits = _fused_call(x6, w_taps, b_conv, w_fc_p, b_fc_p)  # (B, 128)
    return logits[:, :NUM_CLASSES]


def reference_forward(x, conv_w, conv_b, fc_w, fc_b):
    """Pure-JAX reference matching the PyTorch module."""
    y = jax.lax.conv_general_dilated(
        x, conv_w, window_strides=(1,), padding="VALID",
        dimension_numbers=("NCH", "OIH", "NCH"))
    y = y + conv_b[None, :, None]
    y = jnp.maximum(y, 0.0)
    y = jnp.maximum(y[:, :, 0::2], y[:, :, 1::2])   # MaxPool1d(2) (182 is even)
    flat = y.reshape(y.shape[0], -1)
    return flat @ fc_w.T + fc_b


if __name__ == "__main__":
    key = jax.random.PRNGKey(0)
    kx, kw1, kb1, kw2, kb2 = jax.random.split(key, 5)

    # Deterministic init mimicking nn.Conv1d / nn.Linear default uniform bounds.
    bound1 = 1.0 / (1 * K) ** 0.5
    conv_w = jax.random.uniform(kw1, (C_OUT, 1, K), jnp.float32, -bound1, bound1)
    conv_b = jax.random.uniform(kb1, (C_OUT,), jnp.float32, -bound1, bound1)
    bound2 = 1.0 / FLAT ** 0.5
    fc_w = jax.random.uniform(kw2, (NUM_CLASSES, FLAT), jnp.float32, -bound2, bound2)
    fc_b = jax.random.uniform(kb2, (NUM_CLASSES,), jnp.float32, -bound2, bound2)

    x = jax.random.normal(kx, (B, 1, L), jnp.float32)

    params = prepare_params(conv_w, conv_b, fc_w, fc_b)   # one-time re-layout
    out = simple_cnn_forward(x, *params)
    out = jax.block_until_ready(out)

    ref = reference_forward(x, conv_w, conv_b, fc_w, fc_b)
    assert out.shape == (B, NUM_CLASSES)
    assert jnp.allclose(out, ref, atol=1e-4, rtol=1e-4)
    print("KERNEL_OK")
</pallas_src>

<mosaic_0001>
module attributes {stable_mosaic.version = 11 : i64} {
  func.func @_simple_cnn_kernel(%arg0: i32, %arg1: memref<2x8x128xf32, #tpu.memory_space<vmem>>, %arg2: memref<5x16x128xf32, #tpu.memory_space<vmem>>, %arg3: memref<16x128xf32, #tpu.memory_space<vmem>>, %arg4: memref<16x128x128xf32, #tpu.memory_space<vmem>>, %arg5: memref<1x128xf32, #tpu.memory_space<vmem>>, %arg6: memref<2x128xf32, #tpu.memory_space<vmem>>, %arg7: memref<2x16x128xf32, #tpu.memory_space<vmem>>) attributes {dimension_semantics = [#tpu.dimension_semantics<arbitrary>], iteration_bounds = array<i64: 1>, scalar_prefetch = 0 : i64, scratch_operands = 1 : i64, tpu.core_type = #tpu.core_type<tc>, window_params = [{pipeline_mode = #tpu.pipeline_mode<synchronous>, transform_indices = @transform_0, window_bounds = array<i64: 2, 8, 128>}, {pipeline_mode = #tpu.pipeline_mode<synchronous>, transform_indices = @transform_1, window_bounds = array<i64: 5, 16, 128>}, {pipeline_mode = #tpu.pipeline_mode<synchronous>, transform_indices = @transform_2, window_bounds = array<i64: 16, 128>}, {pipeline_mode = #tpu.pipeline_mode<synchronous>, transform_indices = @transform_3, window_bounds = array<i64: 16, 128, 128>}, {pipeline_mode = #tpu.pipeline_mode<synchronous>, transform_indices = @transform_4, window_bounds = array<i64: 1, 128>}, {pipeline_mode = #tpu.pipeline_mode<synchronous>, transform_indices = @transform_5, window_bounds = array<i64: 2, 128>}]} {
    %c0 = arith.constant 0 : index
    %c0_0 = arith.constant 0 : index
    %c0_1 = arith.constant 0 : index
    %0 = vector.load %arg1[%c0, %c0_0, %c0_1] : memref<2x8x128xf32, #tpu.memory_space<vmem>>, vector<2x1x128xf32>
    %c0_2 = arith.constant 0 : index
    %c1 = arith.constant 1 : index
    %c0_3 = arith.constant 0 : index
    %1 = vector.load %arg1[%c0_2, %c1, %c0_3] : memref<2x8x128xf32, #tpu.memory_space<vmem>>, vector<2x1x128xf32>
    %c0_4 = arith.constant 0 : index
    %c2 = arith.constant 2 : index
    %c0_5 = arith.constant 0 : index
    %2 = vector.load %arg1[%c0_4, %c2, %c0_5] : memref<2x8x128xf32, #tpu.memory_space<vmem>>, vector<2x1x128xf32>
    %c0_6 = arith.constant 0 : index
    %c3 = arith.constant 3 : index
    %c0_7 = arith.constant 0 : index
    %3 = vector.load %arg1[%c0_6, %c3, %c0_7] : memref<2x8x128xf32, #tpu.memory_space<vmem>>, vector<2x1x128xf32>
    %c0_8 = arith.constant 0 : index
    %c4 = arith.constant 4 : index
    %c0_9 = arith.constant 0 : index
    %4 = vector.load %arg1[%c0_8, %c4, %c0_9] : memref<2x8x128xf32, #tpu.memory_space<vmem>>, vector<2x1x128xf32>
    %c0_10 = arith.constant 0 : index
    %c5 = arith.constant 5 : index
    %c0_11 = arith.constant 0 : index
    %5 = vector.load %arg1[%c0_10, %c5, %c0_11] : memref<2x8x128xf32, #tpu.memory_space<vmem>>, vector<2x1x128xf32>
    %c0_12 = arith.constant 0 : index
    %c0_13 = arith.constant 0 : index
    %c0_14 = arith.constant 0 : index
    %6 = vector.load %arg2[%c0_12, %c0_13, %c0_14] : memref<5x16x128xf32, #tpu.memory_space<vmem>>, vector<1x16x128xf32>
    %7 = vector.shape_cast %6 : vector<1x16x128xf32> to vector<16x128xf32>
    %c1_15 = arith.constant 1 : index
    %c0_16 = arith.constant 0 : index
    %c0_17 = arith.constant 0 : index
    %8 = vector.load %arg2[%c1_15, %c0_16, %c0_17] : memref<5x16x128xf32, #tpu.memory_space<vmem>>, vector<1x16x128xf32>
    %9 = vector.shape_cast %8 : vector<1x16x128xf32> to vector<16x128xf32>
    %c2_18 = arith.constant 2 : index
    %c0_19 = arith.constant 0 : index
    %c0_20 = arith.constant 0 : index
    %10 = vector.load %arg2[%c2_18, %c0_19, %c0_20] : memref<5x16x128xf32, #tpu.memory_space<vmem>>, vector<1x16x128xf32>
    %11 = vector.shape_cast %10 : vector<1x16x128xf32> to vector<16x128xf32>
    %c3_21 = arith.constant 3 : index
    %c0_22 = arith.constant 0 : index
    %c0_23 = arith.constant 0 : index
    %12 = vector.load %arg2[%c3_21, %c0_22, %c0_23] : memref<5x16x128xf32, #tpu.memory_space<vmem>>, vector<1x16x128xf32>
    %13 = vector.shape_cast %12 : vector<1x16x128xf32> to vector<16x128xf32>
    %c4_24 = arith.constant 4 : index
    %c0_25 = arith.constant 0 : index
    %c0_26 = arith.constant 0 : index
    %14 = vector.load %arg2[%c4_24, %c0_25, %c0_26] : memref<5x16x128xf32, #tpu.memory_space<vmem>>, vector<1x16x128xf32>
    %15 = vector.shape_cast %14 : vector<1x16x128xf32> to vector<16x128xf32>
    %c0_27 = arith.constant 0 : index
    %c0_28 = arith.constant 0 : index
    %16 = vector.load %arg3[%c0_27, %c0_28] : memref<16x128xf32, #tpu.memory_space<vmem>>, vector<16x128xf32>
    %17 = vector.shape_cast %7 : vector<16x128xf32> to vector<1x16x128xf32>
    %18 = vector.broadcast %0 : vector<2x1x128xf32> to vector<2x16x128xf32>
    %19 = vector.broadcast %17 : vector<1x16x128xf32> to vector<2x16x128xf32>
    %20 = arith.mulf %18, %19 : vector<2x16x128xf32>
    %21 = vector.shape_cast %9 : vector<16x128xf32> to vector<1x16x128xf32>
    %22 = vector.broadcast %1 : vector<2x1x128xf32> to vector<2x16x128xf32>
    %23 = vector.broadcast %21 : vector<1x16x128xf32> to vector<2x16x128xf32>
    %24 = arith.mulf %22, %23 : vector<2x16x128xf32>
    %25 = arith.addf %20, %24 : vector<2x16x128xf32>
    %26 = vector.shape_cast %11 : vector<16x128xf32> to vector<1x16x128xf32>
    %27 = vector.broadcast %2 : vector<2x1x128xf32> to vector<2x16x128xf32>
    %28 = vector.broadcast %26 : vector<1x16x128xf32> to vector<2x16x128xf32>
    %29 = arith.mulf %27, %28 : vector<2x16x128xf32>
    %30 = arith.addf %25, %29 : vector<2x16x128xf32>
    %31 = vector.shape_cast %13 : vector<16x128xf32> to vector<1x16x128xf32>
    %32 = vector.broadcast %3 : vector<2x1x128xf32> to vector<2x16x128xf32>
    %33 = vector.broadcast %31 : vector<1x16x128xf32> to vector<2x16x128xf32>
    %34 = arith.mulf %32, %33 : vector<2x16x128xf32>
    %35 = arith.addf %30, %34 : vector<2x16x128xf32>
    %36 = vector.shape_cast %15 : vector<16x128xf32> to vector<1x16x128xf32>
    %37 = vector.broadcast %4 : vector<2x1x128xf32> to vector<2x16x128xf32>
    %38 = vector.broadcast %36 : vector<1x16x128xf32> to vector<2x16x128xf32>
    %39 = arith.mulf %37, %38 : vector<2x16x128xf32>
    %40 = arith.addf %35, %39 : vector<2x16x128xf32>
    %41 = vector.shape_cast %16 : vector<16x128xf32> to vector<1x16x128xf32>
    %42 = vector.broadcast %41 : vector<1x16x128xf32> to vector<2x16x128xf32>
    %43 = arith.addf %40, %42 : vector<2x16x128xf32>
    %44 = vector.shape_cast %7 : vector<16x128xf32> to vector<1x16x128xf32>
    %45 = vector.broadcast %1 : vector<2x1x128xf32> to vector<2x16x128xf32>
    %46 = vector.broadcast %44 : vector<1x16x128xf32> to vector<2x16x128xf32>
    %47 = arith.mulf %45, %46 : vector<2x16x128xf32>
    %48 = vector.shape_cast %9 : vector<16x128xf32> to vector<1x16x128xf32>
    %49 = vector.broadcast %2 : vector<2x1x128xf32> to vector<2x16x128xf32>
    %50 = vector.broadcast %48 : vector<1x16x128xf32> to vector<2x16x128xf32>
    %51 = arith.mulf %49, %50 : vector<2x16x128xf32>
    %52 = arith.addf %47, %51 : vector<2x16x128xf32>
    %53 = vector.shape_cast %11 : vector<16x128xf32> to vector<1x16x128xf32>
    %54 = vector.broadcast %3 : vector<2x1x128xf32> to vector<2x16x128xf32>
    %55 = vector.broadcast %53 : vector<1x16x128xf32> to vector<2x16x128xf32>
    %56 = arith.mulf %54, %55 : vector<2x16x128xf32>
    %57 = arith.addf %52, %56 : vector<2x16x128xf32>
    %58 = vector.shape_cast %13 : vector<16x128xf32> to vector<1x16x128xf32>
    %59 = vector.broadcast %4 : vector<2x1x128xf32> to vector<2x16x128xf32>
    %60 = vector.broadcast %58 : vector<1x16x128xf32> to vector<2x16x128xf32>
    %61 = arith.mulf %59, %60 : vector<2x16x128xf32>
    %62 = arith.addf %57, %61 : vector<2x16x128xf32>
    %63 = vector.shape_cast %15 : vector<16x128xf32> to vector<1x16x128xf32>
    %64 = vector.broadcast %5 : vector<2x1x128xf32> to vector<2x16x128xf32>
    %65 = vector.broadcast %63 : vector<1x16x128xf32> to vector<2x16x128xf32>
    %66 = arith.mulf %64, %65 : vector<2x16x128xf32>
    %67 = arith.addf %62, %66 : vector<2x16x128xf32>
    %68 = vector.shape_cast %16 : vector<16x128xf32> to vector<1x16x128xf32>
    %69 = vector.broadcast %68 : vector<1x16x128xf32> to vector<2x16x128xf32>
    %70 = arith.addf %67, %69 : vector<2x16x128xf32>
    %71 = arith.maximumf %43, %70 : vector<2x16x128xf32>
    %cst = arith.constant 0.000000e+00 : f32
    %72 = vector.broadcast %cst : f32 to vector<2x16x128xf32>
    %73 = arith.maximumf %71, %72 : vector<2x16x128xf32>
    %c0_29 = arith.constant 0 : index
    %c0_30 = arith.constant 0 : index
    %c0_31 = arith.constant 0 : index
    %74 = vector.load %arg7[%c0_29, %c0_30, %c0_31] : memref<2x16x128xf32, #tpu.memory_space<vmem>>, vector<2x16x128xf32>
    tpu.vector_store %arg7[%c0_29, %c0_30, %c0_31], %73 {strides = array<i32>} : memref<2x16x128xf32, #tpu.memory_space<vmem>>, vector<2x16x128xf32>,
    %cst_32 = arith.constant 0.000000e+00 : f32
    %75 = vector.broadcast %cst_32 : f32 to vector<2x128xf32>
    %c0_33 = arith.constant 0 : index
    %c0_34 = arith.constant 0 : index
    %c0_35 = arith.constant 0 : index
    %76 = vector.load %arg7[%c0_33, %c0_34, %c0_35] : memref<2x16x128xf32, #tpu.memory_space<vmem>>, vector<2x1x128xf32>
    %77 = vector.shape_cast %76 : vector<2x1x128xf32> to vector<2x128xf32>
    %c0_36 = arith.constant 0 : index
    %c0_37 = arith.constant 0 : index
    %c0_38 = arith.constant 0 : index
    %78 = vector.load %arg4[%c0_36, %c0_37, %c0_38] : memref<16x128x128xf32, #tpu.memory_space<vmem>>, vector<1x128x128xf32>
    %79 = vector.shape_cast %78 : vector<1x128x128xf32> to vector<128x128xf32>
    %cst_39 = arith.constant dense<0.000000e+00> : vector<2x128xf32>
    %80 = tpu.matmul %77, %79, %cst_39 {dimension_numbers = #tpu.dot_dimension_numbers<[1], [0], [0], [1], [0, 0, 1, 1], [], []>} : vector<2x128xf32>, vector<128x128xf32>, vector<2x128xf32> -> vector<2x128xf32>
    %81 = arith.addf %75, %80 : vector<2x128xf32>
    %c0_40 = arith.constant 0 : index
    %c1_41 = arith.constant 1 : index
    %c0_42 = arith.constant 0 : index
    %82 = vector.load %arg7[%c0_40, %c1_41, %c0_42] : memref<2x16x128xf32, #tpu.memory_space<vmem>>, vector<2x1x128xf32>
    %83 = vector.shape_cast %82 : vector<2x1x128xf32> to vector<2x128xf32>
    %c1_43 = arith.constant 1 : index
    %c0_44 = arith.constant 0 : index
    %c0_45 = arith.constant 0 : index
    %84 = vector.load %arg4[%c1_43, %c0_44, %c0_45] : memref<16x128x128xf32, #tpu.memory_space<vmem>>, vector<1x128x128xf32>
    %85 = vector.shape_cast %84 : vector<1x128x128xf32> to vector<128x128xf32>
    %cst_46 = arith.constant dense<0.000000e+00> : vector<2x128xf32>
    %86 = tpu.matmul %83, %85, %cst_46 {dimension_numbers = #tpu.dot_dimension_numbers<[1], [0], [0], [1], [0, 0, 1, 1], [], []>} : vector<2x128xf32>, vector<128x128xf32>, vector<2x128xf32> -> vector<2x128xf32>
    %87 = arith.addf %81, %86 : vector<2x128xf32>
    %c0_47 = arith.constant 0 : index
    %c2_48 = arith.constant 2 : index
    %c0_49 = arith.constant 0 : index
    %88 = vector.load %arg7[%c0_47, %c2_48, %c0_49] : memref<2x16x128xf32, #tpu.memory_space<vmem>>, vector<2x1x128xf32>
    %89 = vector.shape_cast %88 : vector<2x1x128xf32> to vector<2x128xf32>
    %c2_50 = arith.constant 2 : index
    %c0_51 = arith.constant 0 : index
    %c0_52 = arith.constant 0 : index
    %90 = vector.load %arg4[%c2_50, %c0_51, %c0_52] : memref<16x128x128xf32, #tpu.memory_space<vmem>>, vector<1x128x128xf32>
    %91 = vector.shape_cast %90 : vector<1x128x128xf32> to vector<128x128xf32>
    %cst_53 = arith.constant dense<0.000000e+00> : vector<2x128xf32>
    %92 = tpu.matmul %89, %91, %cst_53 {dimension_numbers = #tpu.dot_dimension_numbers<[1], [0], [0], [1], [0, 0, 1, 1], [], []>} : vector<2x128xf32>, vector<128x128xf32>, vector<2x128xf32> -> vector<2x128xf32>
    %93 = arith.addf %87, %92 : vector<2x128xf32>
    %c0_54 = arith.constant 0 : index
    %c3_55 = arith.constant 3 : index
    %c0_56 = arith.constant 0 : index
    %94 = vector.load %arg7[%c0_54, %c3_55, %c0_56] : memref<2x16x128xf32, #tpu.memory_space<vmem>>, vector<2x1x128xf32>
    %95 = vector.shape_cast %94 : vector<2x1x128xf32> to vector<2x128xf32>
    %c3_57 = arith.constant 3 : index
    %c0_58 = arith.constant 0 : index
    %c0_59 = arith.constant 0 : index
    %96 = vector.load %arg4[%c3_57, %c0_58, %c0_59] : memref<16x128x128xf32, #tpu.memory_space<vmem>>, vector<1x128x128xf32>
    %97 = vector.shape_cast %96 : vector<1x128x128xf32> to vector<128x128xf32>
    %cst_60 = arith.constant dense<0.000000e+00> : vector<2x128xf32>
    %98 = tpu.matmul %95, %97, %cst_60 {dimension_numbers = #tpu.dot_dimension_numbers<[1], [0], [0], [1], [0, 0, 1, 1], [], []>} : vector<2x128xf32>, vector<128x128xf32>, vector<2x128xf32> -> vector<2x128xf32>
    %99 = arith.addf %93, %98 : vector<2x128xf32>
    %c0_61 = arith.constant 0 : index
    %c4_62 = arith.constant 4 : index
    %c0_63 = arith.constant 0 : index
    %100 = vector.load %arg7[%c0_61, %c4_62, %c0_63] : memref<2x16x128xf32, #tpu.memory_space<vmem>>, vector<2x1x128xf32>
    %101 = vector.shape_cast %100 : vector<2x1x128xf32> to vector<2x128xf32>
    %c4_64 = arith.constant 4 : index
    %c0_65 = arith.constant 0 : index
    %c0_66 = arith.constant 0 : index
    %102 = vector.load %arg4[%c4_64, %c0_65, %c0_66] : memref<16x128x128xf32, #tpu.memory_space<vmem>>, vector<1x128x128xf32>
    %103 = vector.shape_cast %102 : vector<1x128x128xf32> to vector<128x128xf32>
    %cst_67 = arith.constant dense<0.000000e+00> : vector<2x128xf32>
    %104 = tpu.matmul %101, %103, %cst_67 {dimension_numbers = #tpu.dot_dimension_numbers<[1], [0], [0], [1], [0, 0, 1, 1], [], []>} : vector<2x128xf32>, vector<128x128xf32>, vector<2x128xf32> -> vector<2x128xf32>
    %105 = arith.addf %99, %104 : vector<2x128xf32>
    %c0_68 = arith.constant 0 : index
    %c5_69 = arith.constant 5 : index
    %c0_70 = arith.constant 0 : index
    %106 = vector.load %arg7[%c0_68, %c5_69, %c0_70] : memref<2x16x128xf32, #tpu.memory_space<vmem>>, vector<2x1x128xf32>
    %107 = vector.shape_cast %106 : vector<2x1x128xf32> to vector<2x128xf32>
    %c5_71 = arith.constant 5 : index
    %c0_72 = arith.constant 0 : index
    %c0_73 = arith.constant 0 : index
    %108 = vector.load %arg4[%c5_71, %c0_72, %c0_73] : memref<16x128x128xf32, #tpu.memory_space<vmem>>, vector<1x128x128xf32>
    %109 = vector.shape_cast %108 : vector<1x128x128xf32> to vector<128x128xf32>
    %cst_74 = arith.constant dense<0.000000e+00> : vector<2x128xf32>
    %110 = tpu.matmul %107, %109, %cst_74 {dimension_numbers = #tpu.dot_dimension_numbers<[1], [0], [0], [1], [0, 0, 1, 1], [], []>} : vector<2x128xf32>, vector<128x128xf32>, vector<2x128xf32> -> vector<2x128xf32>
    %111 = arith.addf %105, %110 : vector<2x128xf32>
    %c0_75 = arith.constant 0 : index
    %c6 = arith.constant 6 : index
    %c0_76 = arith.constant 0 : index
    %112 = vector.load %arg7[%c0_75, %c6, %c0_76] : memref<2x16x128xf32, #tpu.memory_space<vmem>>, vector<2x1x128xf32>
    %113 = vector.shape_cast %112 : vector<2x1x128xf32> to vector<2x128xf32>
    %c6_77 = arith.constant 6 : index
    %c0_78 = arith.constant 0 : index
    %c0_79 = arith.constant 0 : index
    %114 = vector.load %arg4[%c6_77, %c0_78, %c0_79] : memref<16x128x128xf32, #tpu.memory_space<vmem>>, vector<1x128x128xf32>
    %115 = vector.shape_cast %114 : vector<1x128x128xf32> to vector<128x128xf32>
    %cst_80 = arith.constant dense<0.000000e+00> : vector<2x128xf32>
    %116 = tpu.matmul %113, %115, %cst_80 {dimension_numbers = #tpu.dot_dimension_numbers<[1], [0], [0], [1], [0, 0, 1, 1], [], []>} : vector<2x128xf32>, vector<128x128xf32>, vector<2x128xf32> -> vector<2x128xf32>
    %117 = arith.addf %111, %116 : vector<2x128xf32>
    %c0_81 = arith.constant 0 : index
    %c7 = arith.constant 7 : index
    %c0_82 = arith.constant 0 : index
    %118 = vector.load %arg7[%c0_81, %c7, %c0_82] : memref<2x16x128xf32, #tpu.memory_space<vmem>>, vector<2x1x128xf32>
    %119 = vector.shape_cast %118 : vector<2x1x128xf32> to vector<2x128xf32>
    %c7_83 = arith.constant 7 : index
    %c0_84 = arith.constant 0 : index
    %c0_85 = arith.constant 0 : index
    %120 = vector.load %arg4[%c7_83, %c0_84, %c0_85] : memref<16x128x128xf32, #tpu.memory_space<vmem>>, vector<1x128x128xf32>
    %121 = vector.shape_cast %120 : vector<1x128x128xf32> to vector<128x128xf32>
    %cst_86 = arith.constant dense<0.000000e+00> : vector<2x128xf32>
    %122 = tpu.matmul %119, %121, %cst_86 {dimension_numbers = #tpu.dot_dimension_numbers<[1], [0], [0], [1], [0, 0, 1, 1], [], []>} : vector<2x128xf32>, vector<128x128xf32>, vector<2x128xf32> -> vector<2x128xf32>
    %123 = arith.addf %117, %122 : vector<2x128xf32>
    %c0_87 = arith.constant 0 : index
    %c8 = arith.constant 8 : index
    %c0_88 = arith.constant 0 : index
    %124 = vector.load %arg7[%c0_87, %c8, %c0_88] : memref<2x16x128xf32, #tpu.memory_space<vmem>>, vector<2x1x128xf32>
    %125 = vector.shape_cast %124 : vector<2x1x128xf32> to vector<2x128xf32>
    %c8_89 = arith.constant 8 : index
    %c0_90 = arith.constant 0 : index
    %c0_91 = arith.constant 0 : index
    %126 = vector.load %arg4[%c8_89, %c0_90, %c0_91] : memref<16x128x128xf32, #tpu.memory_space<vmem>>, vector<1x128x128xf32>
    %127 = vector.shape_cast %126 : vector<1x128x128xf32> to vector<128x128xf32>
    %cst_92 = arith.constant dense<0.000000e+00> : vector<2x128xf32>
    %128 = tpu.matmul %125, %127, %cst_92 {dimension_numbers = #tpu.dot_dimension_numbers<[1], [0], [0], [1], [0, 0, 1, 1], [], []>} : vector<2x128xf32>, vector<128x128xf32>, vector<2x128xf32> -> vector<2x128xf32>
    %129 = arith.addf %123, %128 : vector<2x128xf32>
    %c0_93 = arith.constant 0 : index
    %c9 = arith.constant 9 : index
    %c0_94 = arith.constant 0 : index
    %130 = vector.load %arg7[%c0_93, %c9, %c0_94] : memref<2x16x128xf32, #tpu.memory_space<vmem>>, vector<2x1x128xf32>
    %131 = vector.shape_cast %130 : vector<2x1x128xf32> to vector<2x128xf32>
    %c9_95 = arith.constant 9 : index
    %c0_96 = arith.constant 0 : index
    %c0_97 = arith.constant 0 : index
    %132 = vector.load %arg4[%c9_95, %c0_96, %c0_97] : memref<16x128x128xf32, #tpu.memory_space<vmem>>, vector<1x128x128xf32>
    %133 = vector.shape_cast %132 : vector<1x128x128xf32> to vector<128x128xf32>
    %cst_98 = arith.constant dense<0.000000e+00> : vector<2x128xf32>
    %134 = tpu.matmul %131, %133, %cst_98 {dimension_numbers = #tpu.dot_dimension_numbers<[1], [0], [0], [1], [0, 0, 1, 1], [], []>} : vector<2x128xf32>, vector<128x128xf32>, vector<2x128xf32> -> vector<2x128xf32>
    %135 = arith.addf %129, %134 : vector<2x128xf32>
    %c0_99 = arith.constant 0 : index
    %c10 = arith.constant 10 : index
    %c0_100 = arith.constant 0 : index
    %136 = vector.load %arg7[%c0_99, %c10, %c0_100] : memref<2x16x128xf32, #tpu.memory_space<vmem>>, vector<2x1x128xf32>
    %137 = vector.shape_cast %136 : vector<2x1x128xf32> to vector<2x128xf32>
    %c10_101 = arith.constant 10 : index
    %c0_102 = arith.constant 0 : index
    %c0_103 = arith.constant 0 : index
    %138 = vector.load %arg4[%c10_101, %c0_102, %c0_103] : memref<16x128x128xf32, #tpu.memory_space<vmem>>, vector<1x128x128xf32>
    %139 = vector.shape_cast %138 : vector<1x128x128xf32> to vector<128x128xf32>
    %cst_104 = arith.constant dense<0.000000e+00> : vector<2x128xf32>
    %140 = tpu.matmul %137, %139, %cst_104 {dimension_numbers = #tpu.dot_dimension_numbers<[1], [0], [0], [1], [0, 0, 1, 1], [], []>} : vector<2x128xf32>, vector<128x128xf32>, vector<2x128xf32> -> vector<2x128xf32>
    %141 = arith.addf %135, %140 : vector<2x128xf32>
    %c0_105 = arith.constant 0 : index
    %c11 = arith.constant 11 : index
    %c0_106 = arith.constant 0 : index
    %142 = vector.load %arg7[%c0_105, %c11, %c0_106] : memref<2x16x128xf32, #tpu.memory_space<vmem>>, vector<2x1x128xf32>
    %143 = vector.shape_cast %142 : vector<2x1x128xf32> to vector<2x128xf32>
    %c11_107 = arith.constant 11 : index
    %c0_108 = arith.constant 0 : index
    %c0_109 = arith.constant 0 : index
    %144 = vector.load %arg4[%c11_107, %c0_108, %c0_109] : memref<16x128x128xf32, #tpu.memory_space<vmem>>, vector<1x128x128xf32>
    %145 = vector.shape_cast %144 : vector<1x128x128xf32> to vector<128x128xf32>
    %cst_110 = arith.constant dense<0.000000e+00> : vector<2x128xf32>
    %146 = tpu.matmul %143, %145, %cst_110 {dimension_numbers = #tpu.dot_dimension_numbers<[1], [0], [0], [1], [0, 0, 1, 1], [], []>} : vector<2x128xf32>, vector<128x128xf32>, vector<2x128xf32> -> vector<2x128xf32>
    %147 = arith.addf %141, %146 : vector<2x128xf32>
    %c0_111 = arith.constant 0 : index
    %c12 = arith.constant 12 : index
    %c0_112 = arith.constant 0 : index
    %148 = vector.load %arg7[%c0_111, %c12, %c0_112] : memref<2x16x128xf32, #tpu.memory_space<vmem>>, vector<2x1x128xf32>
    %149 = vector.shape_cast %148 : vector<2x1x128xf32> to vector<2x128xf32>
    %c12_113 = arith.constant 12 : index
    %c0_114 = arith.constant 0 : index
    %c0_115 = arith.constant 0 : index
    %150 = vector.load %arg4[%c12_113, %c0_114, %c0_115] : memref<16x128x128xf32, #tpu.memory_space<vmem>>, vector<1x128x128xf32>
    %151 = vector.shape_cast %150 : vector<1x128x128xf32> to vector<128x128xf32>
    %cst_116 = arith.constant dense<0.000000e+00> : vector<2x128xf32>
    %152 = tpu.matmul %149, %151, %cst_116 {dimension_numbers = #tpu.dot_dimension_numbers<[1], [0], [0], [1], [0, 0, 1, 1], [], []>} : vector<2x128xf32>, vector<128x128xf32>, vector<2x128xf32> -> vector<2x128xf32>
    %153 = arith.addf %147, %152 : vector<2x128xf32>
    %c0_117 = arith.constant 0 : index
    %c13 = arith.constant 13 : index
    %c0_118 = arith.constant 0 : index
    %154 = vector.load %arg7[%c0_117, %c13, %c0_118] : memref<2x16x128xf32, #tpu.memory_space<vmem>>, vector<2x1x128xf32>
    %155 = vector.shape_cast %154 : vector<2x1x128xf32> to vector<2x128xf32>
    %c13_119 = arith.constant 13 : index
    %c0_120 = arith.constant 0 : index
    %c0_121 = arith.constant 0 : index
    %156 = vector.load %arg4[%c13_119, %c0_120, %c0_121] : memref<16x128x128xf32, #tpu.memory_space<vmem>>, vector<1x128x128xf32>
    %157 = vector.shape_cast %156 : vector<1x128x128xf32> to vector<128x128xf32>
    %cst_122 = arith.constant dense<0.000000e+00> : vector<2x128xf32>
    %158 = tpu.matmul %155, %157, %cst_122 {dimension_numbers = #tpu.dot_dimension_numbers<[1], [0], [0], [1], [0, 0, 1, 1], [], []>} : vector<2x128xf32>, vector<128x128xf32>, vector<2x128xf32> -> vector<2x128xf32>
    %159 = arith.addf %153, %158 : vector<2x128xf32>
    %c0_123 = arith.constant 0 : index
    %c14 = arith.constant 14 : index
    %c0_124 = arith.constant 0 : index
    %160 = vector.load %arg7[%c0_123, %c14, %c0_124] : memref<2x16x128xf32, #tpu.memory_space<vmem>>, vector<2x1x128xf32>
    %161 = vector.shape_cast %160 : vector<2x1x128xf32> to vector<2x128xf32>
    %c14_125 = arith.constant 14 : index
    %c0_126 = arith.constant 0 : index
    %c0_127 = arith.constant 0 : index
    %162 = vector.load %arg4[%c14_125, %c0_126, %c0_127] : memref<16x128x128xf32, #tpu.memory_space<vmem>>, vector<1x128x128xf32>
    %163 = vector.shape_cast %162 : vector<1x128x128xf32> to vector<128x128xf32>
    %cst_128 = arith.constant dense<0.000000e+00> : vector<2x128xf32>
    %164 = tpu.matmul %161, %163, %cst_128 {dimension_numbers = #tpu.dot_dimension_numbers<[1], [0], [0], [1], [0, 0, 1, 1], [], []>} : vector<2x128xf32>, vector<128x128xf32>, vector<2x128xf32> -> vector<2x128xf32>
    %165 = arith.addf %159, %164 : vector<2x128xf32>
    %c0_129 = arith.constant 0 : index
    %c15 = arith.constant 15 : index
    %c0_130 = arith.constant 0 : index
    %166 = vector.load %arg7[%c0_129, %c15, %c0_130] : memref<2x16x128xf32, #tpu.memory_space<vmem>>, vector<2x1x128xf32>
    %167 = vector.shape_cast %166 : vector<2x1x128xf32> to vector<2x128xf32>
    %c15_131 = arith.constant 15 : index
    %c0_132 = arith.constant 0 : index
    %c0_133 = arith.constant 0 : index
    %168 = vector.load %arg4[%c15_131, %c0_132, %c0_133] : memref<16x128x128xf32, #tpu.memory_space<vmem>>, vector<1x128x128xf32>
    %169 = vector.shape_cast %168 : vector<1x128x128xf32> to vector<128x128xf32>
    %cst_134 = arith.constant dense<0.000000e+00> : vector<2x128xf32>
    %170 = tpu.matmul %167, %169, %cst_134 {dimension_numbers = #tpu.dot_dimension_numbers<[1], [0], [0], [1], [0, 0, 1, 1], [], []>} : vector<2x128xf32>, vector<128x128xf32>, vector<2x128xf32> -> vector<2x128xf32>
    %171 = arith.addf %165, %170 : vector<2x128xf32>
    %c0_135 = arith.constant 0 : index
    %c0_136 = arith.constant 0 : index
    %172 = vector.load %arg5[%c0_135, %c0_136] : memref<1x128xf32, #tpu.memory_space<vmem>>, vector<1x128xf32>
    %173 = vector.broadcast %172 : vector<1x128xf32> to vector<2x128xf32>
    %174 = arith.addf %171, %173 : vector<2x128xf32>
    %c0_137 = arith.constant 0 : index
    %c0_138 = arith.constant 0 : index
    %175 = vector.load %arg6[%c0_137, %c0_138] : memref<2x128xf32, #tpu.memory_space<vmem>>, vector<2x128xf32>
    tpu.vector_store %arg6[%c0_137, %c0_138], %174 {strides = array<i32>} : memref<2x128xf32, #tpu.memory_space<vmem>>, vector<2x128xf32>,
    return
  }
  func.func @transform_0(%arg0: i32) -> (i32, i32, i32) {
    %c0_i32 = arith.constant 0 : i32
    %c0_i32_0 = arith.constant 0 : i32
    %c0_i32_1 = arith.constant 0 : i32
    %c0_i32_2 = arith.constant 0 : i32
    return %c0_i32, %c0_i32_0, %c0_i32_1 : i32, i32, i32
  }
  func.func @transform_1(%arg0: i32) -> (i32, i32, i32) {
    %c0_i32 = arith.constant 0 : i32
    %c0_i32_0 = arith.constant 0 : i32
    %c0_i32_1 = arith.constant 0 : i32
    %c0_i32_2 = arith.constant 0 : i32
    return %c0_i32, %c0_i32_0, %c0_i32_1 : i32, i32, i32
  }
  func.func @transform_2(%arg0: i32) -> (i32, i32) {
    %c0_i32 = arith.constant 0 : i32
    %c0_i32_0 = arith.constant 0 : i32
    %c0_i32_1 = arith.constant 0 : i32
    return %c0_i32, %c0_i32_0 : i32, i32
  }
  func.func @transform_3(%arg0: i32) -> (i32, i32, i32) {
    %c0_i32 = arith.constant 0 : i32
    %c0_i32_0 = arith.constant 0 : i32
    %c0_i32_1 = arith.constant 0 : i32
    %c0_i32_2 = arith.constant 0 : i32
    return %c0_i32, %c0_i32_0, %c0_i32_1 : i32, i32, i32
  }
  func.func @transform_4(%arg0: i32) -> (i32, i32) {
    %c0_i32 = arith.constant 0 : i32
    %c0_i32_0 = arith.constant 0 : i32
    %c0_i32_1 = arith.constant 0 : i32
    return %c0_i32, %c0_i32_0 : i32, i32
  }
  func.func @transform_5(%arg0: i32) -> (i32, i32) {
    %c0_i32 = arith.constant 0 : i32
    %c0_i32_0 = arith.constant 0 : i32
    %c0_i32_1 = arith.constant 0 : i32
    return %c0_i32, %c0_i32_0 : i32, i32
  }
}

</mosaic_0001>

<bundles_post_ra>
// kernel: simple_cnn_forward.1
= control target key start
LH: loop header
LB: loop body
LE: loop exit
PB: predicated region body
PF: predicated region fallthrough
CT: control target
= control target key end

     0   :  { %10 = vsyncpa [#allocation4], 0  ;;  %s3446_s0 = inlined_call_operand.vmem [shape: f32[2,8,128], index: 0, kind: input, shape index: {}]   ;;  %s3447_s1 = inlined_call_operand.vmem [shape: f32[5,16,128], index: 1, kind: input, shape index: {}]   ;;  %s3448_s2 = inlined_call_operand.vmem [shape: f32[16,128], index: 2, kind: input, shape index: {}]   ;;  %s3449_s3 = inlined_call_operand.hbm [shape: f32[16,128,128], index: 3, kind: input, shape index: {}]   ;;  %s3450_s4 = inlined_call_operand.vmem [shape: f32[1,128], index: 4, kind: input, shape index: {}]   ;;  %s3451_s5 = inlined_call_operand.hbm [shape: f32[2,128], index: 5, kind: output, shape index: {}]  }
   0x1   :  { %11 = vsyncpa [#allocation5], 0  ;;  %s3037_s18 = smov [#allocation3]   ;;  %s2989_s22 = scalar_lea.hbm %s3449_s3, 32768 }
   0x2   :  { %s23_s19 = sshll.u32 %s3037_s18, 4  ;;  %p2990_p0 = scmp.ne.s32.totalorder %s3449_s3, %s2989_s22  ;;  %s24_s19 = int_to_ptr.vmem [resolvable:$true] %s23_s19 }
   0x3   :  { %p2993_p1 = scmp.lt.u32.totalorder %s2989_s22, %s3449_s3 }
   0x5   :  { %p2995_p2 = pnand %p2993_p1, %p2990_p0 }
   0x7   :  { %2998 = shalt.err (!%p2995_p2)
}
   0x8   :  { %s2999_s27 = scalar_lea.vmem %s24_s19, 32768  ;;  %p3004_p4 = scmp.lt.s32.totalorder %s24_s19, %s24_s19 }
   0x9   :  { %p3000_p3 = scmp.ne.s32.totalorder %s24_s19, %s2999_s27  ;;  %p3005_p5 = scmp.lt.s32.totalorder %s2999_s27, %s2999_s27 }
   0xb   :  { %p3006_p6 = por %p3005_p5, %p3004_p4 }
   0xd   :  { %p3007_p7 = pnand %p3006_p6, %p3000_p3 }
   0xf   :  { %3010 = shalt.err (!%p3007_p7)
}
  0x10   :  { %s3038_s28 = smov 128   ;;  %s3039_s29 = smov 8  }
  0x11   :  { %29 = dma.hbm_to_vmem [thread:$0]  %s3449_s3, 32768, %s24_s19, [#allocation4], %s3038_s28, %s3038_s28, %s3039_s29  }
  0x12   :  { %3033 = dma.done.wait [#allocation4], 32768  }
  0x13   :  { %3034 = vsyncadd [#allocation4], 4294934528  ;;  %v3040_v0 = vmov 0.0|0.0   ;;  %vm3041_vm0 = vmmov 0   ;;  %v3042_v1 = vmov 0.0   ;;  %v224_v2 = vld [vmem:[#allocation3 + $0x80] sm:$0xff] }
  0x14   :  { %2598 = vmatprep.subr.bf16.mxu0 %v3040_v0  ;;  %2622 = vmatprep.subr.bf16.mxu1 %v3040_v0  ;;  %v225_v3 = vld [vmem:[#allocation3 + $0x88] sm:$0xff]  ;;  %v205_v4 = vld [vmem:[#allocation3] sm:$0xff]  ;;  %v226_v7 = vld [vmem:[#allocation3 + $0x90] sm:$0xff]  ;;  %vm243_vm1 = vcmask 1041409   ;;  %s3043_s27 = smov [#allocation6]  }
  0x15   :  { %2070 = vmatprep.mubr.msk.f32.mxu0 %vm3041_vm0, %v3042_v1  ;;  %2105 = vmatprep.mubr.msk.f32.mxu1 %vm3041_vm0, %v3042_v1  ;;  %v2599_v5 = vpack.c.bf16 %v225_v3, %v224_v2  ;;  %v206_v6 = vld [vmem:[#allocation3 + $0x8] sm:$0xff]  ;;  %v227_v8 = vld [vmem:[#allocation3 + $0x98] sm:$0xff]  ;;  %v207_v10 = vld [vmem:[#allocation3 + $0x10] sm:$0xff]  ;;  %s1736_s28 = sshll.u32 %s3043_s27, 4  ;;  %s1737_s28 = int_to_ptr.vmem [resolvable:$true] %s1736_s28 }
  0x16   :  { %v2623_v9 = vpack.c.bf16 %v206_v6, %v205_v4  ;;  %v208_v11 = vld [vmem:[#allocation3 + $0x18] sm:$0xff]  ;;  %v2602_v12 = vpack.c.bf16 %v227_v8, %v226_v7  ;;  %v228_v14 = vld [vmem:[#allocation3 + $0xa0] sm:$0xff]  ;;  %v229_v15 = vld [vmem:[#allocation3 + $0xa8] sm:$0xff]  ;;  %s3011_s29 = scalar_lea.vmem %s1737_s28, 32  ;;  %p3016_p9 = scmp.lt.s32.totalorder %s1737_s28, %s1737_s28 }
  0x17   :  { %2600 = vmatpush3.bf16.msra.mxu0 %v2599_v5  ;;  %v2626_v13 = vpack.c.bf16 %v208_v11, %v207_v10  ;;  %v209_v16 = vld [vmem:[#allocation3 + $0x20] sm:$0xff]  ;;  %v210_v17 = vld [vmem:[#allocation3 + $0x28] sm:$0xff]  ;;  %v2605_v18 = vpack.c.bf16 %v229_v15, %v228_v14  ;;  %v230_v19 = vld [vmem:[#allocation3 + $0xb0] sm:$0xff]  ;;  %p3012_p8 = scmp.ne.s32.totalorder %s1737_s28, %s3011_s29  ;;  %p3017_p10 = scmp.lt.s32.totalorder %s3011_s29, %s3011_s29 }
  0x18   :  { %2624 = vmatpush3.bf16.msra.mxu1 %v2623_v9  ;;  %2601 = vmatprep.subr.bf16.mxu0 %v3040_v0  ;;  %v2629_v20 = vpack.c.bf16 %v210_v17, %v209_v16  ;;  %v231_v21 = vld [vmem:[#allocation3 + $0xb8] sm:$0xff]  ;;  %v211_v22 = vld [vmem:[#allocation3 + $0x30] sm:$0xff]  ;;  %v232_v24 = vld [vmem:[#allocation3 + $0xc0] sm:$0xff] }
  0x19   :  { %2625 = vmatprep.subr.bf16.mxu1 %v3040_v0  ;;  %v212_v23 = vld [vmem:[#allocation3 + $0x38] sm:$0xff]  ;;  %v233_v25 = vld [vmem:[#allocation3 + $0xc8] sm:$0xff]  ;;  %v213_v26 = vld [vmem:[#allocation3 + $0x40] sm:$0xff]  ;;  %v2608_v30 = vpack.c.bf16 %v231_v21, %v230_v19  ;;  %p3018_p11 = por %p3017_p10, %p3016_p9 }
  0x1a   :  { %v214_v27 = vld [vmem:[#allocation3 + $0x48] sm:$0xff]  ;;  %v3096_v28 = vld [vmem:[#allocation3 + $0xd0] sm:$0xff]  ;;  %v3098_v29 = vld [vmem:[#allocation3 + $0xd8] sm:$0xff]  ;;  %v2632_v34 = vpack.c.bf16 %v212_v23, %v211_v22  ;;  %v2611_v39 = vpack.c.bf16 %v233_v25, %v232_v24 }
  0x1b   :  { %2603 = vmatpush3.bf16.msra.mxu0 %v2602_v12  ;;  %v3100_v31 = vld [vmem:[#allocation3 + $0x50] sm:$0xff]  ;;  %v3102_v32 = vld [vmem:[#allocation3 + $0x58] sm:$0xff]  ;;  %v2635_v40 = vpack.c.bf16 %v214_v27, %v213_v26  ;;  %v2614_v41 = vpack.c.bf16 %v3098_v29, %v3096_v28  ;;  %v1745_v46 = vld [vmem:[%s3447_s1 + $0x10] sm:$0xff]  ;;  %p3019_p12 = pnand %p3018_p11, %p3012_p8 }
  0x1c   :  { %2627 = vmatpush3.bf16.msra.mxu1 %v2626_v13  ;;  %2604 = vmatprep.subr.bf16.mxu0 %v3040_v0  ;;  %v3107_v33 = vld [vmem:[%s3446_s0] ss:$0 sm:$0xff]  ;;  %v3113_v35 = vld [vmem:[%s3446_s0 + $0x8] ss:$0 sm:$0xff]  ;;  %v3118_v36 = vld [vmem:[%s3446_s0 + $0x1] ss:$0 sm:$0xff]  ;;  %v2638_v42 = vpack.c.bf16 %v3102_v32, %v3100_v31 }
  0x1d   :  { %2628 = vmatprep.subr.bf16.mxu1 %v3040_v0  ;;  %v3123_v37 = vld [vmem:[%s3446_s0 + $0x9] ss:$0 sm:$0xff]  ;;  %v3129_v38 = vld [vmem:[%s3446_s0 + $0x2] ss:$0 sm:$0xff]  ;;  %v3138_v43 = vld [vmem:[%s3446_s0 + $0xa] ss:$0 sm:$0xff]  ;;  %v83_v56 = vmul.f32 %v3118_v36, %v1745_v46 }
  0x1e   :  { %v3143_v44 = vld [vmem:[%s3446_s0 + $0x3] ss:$0 sm:$0xff]  ;;  %v1749_v48 = vld [vmem:[%s3447_s1 + $0x30] sm:$0xff]  ;;  %v3165_v53 = vld [vmem:[%s3446_s0 + $0xb] ss:$0 sm:$0xff]  ;;  %v85_v57 = vmul.f32 %v3123_v37, %v1745_v46  ;;  %v147_v5 = vmul.f32 %v3129_v38, %v1745_v46  ;;  %v149_v9 = vmul.f32 %v3138_v43, %v1745_v46 }
  0x1f   :  { %2606 = vmatpush3.bf16.msra.mxu0 %v2605_v18  ;;  %v47_v45 = vld [vmem:[%s3447_s1] sm:$0xff]  ;;  %v3182_v59 = vld [vmem:[%s3446_s0 + $0xc] ss:$0 sm:$0xff]  ;;  %v115_v61 = vmul.f32 %v3143_v44, %v1749_v48  ;;  %v117_v62 = vmul.f32 %v3165_v53, %v1749_v48  ;;  %v236_v6 = vld [vmem:[#allocation3 + $0xe0] sm:$0xff] }
  0x20   :  { %2630 = vmatpush3.bf16.msra.mxu1 %v2629_v20  ;;  %2607 = vmatprep.subr.bf16.mxu0 %v3040_v0  ;;  %v1747_v47 = vld [vmem:[%s3447_s1 + $0x20] sm:$0xff]  ;;  %v71_v49 = vmul.f32 %v3107_v33, %v47_v45  ;;  %v73_v50 = vmul.f32 %v3113_v35, %v47_v45  ;;  %v143_v51 = vmul.f32 %v3118_v36, %v47_v45  ;;  %v237_v7 = vld [vmem:[#allocation3 + $0xe8] sm:$0xff]  ;;  %v217_v13 = vld [vmem:[#allocation3 + $0x60] sm:$0xff] }
  0x21   :  { %2631 = vmatprep.subr.bf16.mxu1 %v3040_v0  ;;  %v145_v52 = vmul.f32 %v3123_v37, %v47_v45  ;;  %v3170_v54 = vld [vmem:[%s3446_s0 + $0x4] ss:$0 sm:$0xff]  ;;  %v99_v58 = vmul.f32 %v3129_v38, %v1747_v47  ;;  %v101_v60 = vmul.f32 %v3138_v43, %v1747_v47  ;;  %v3193_v8 = vld [vmem:[%s3446_s0 + $0x5] ss:$0 sm:$0xff]  ;;  %v155_v10 = vmul.f32 %v3143_v44, %v1747_v47  ;;  %v218_v14 = vld [vmem:[#allocation3 + $0x68] sm:$0xff] }
  0x22   :  { %v1751_v55 = vld [vmem:[%s3447_s1 + $0x40] sm:$0xff]  ;;  %v87_v2 = vadd.f32 %v83_v56, %v71_v49  ;;  %v89_v3 = vadd.f32 %v85_v57, %v73_v50  ;;  %v157_v11 = vmul.f32 %v3165_v53, %v1747_v47  ;;  %v163_v12 = vmul.f32 %v3170_v54, %v1749_v48  ;;  %v3203_v15 = vld [vmem:[%s3446_s0 + $0xd] ss:$0 sm:$0xff] }
  0x23   :  { %2609 = vmatpush3.bf16.msra.mxu0 %v2608_v30  ;;  %v131_v63 = vmul.f32 %v3170_v54, %v1751_v55  ;;  %v133_v4 = vmul.f32 %v3182_v59, %v1751_v55  ;;  %v151_v18 = vadd.f32 %v147_v5, %v143_v51  ;;  %v153_v19 = vadd.f32 %v149_v9, %v145_v52  ;;  %v238_v29 = vld [vmem:[#allocation3 + $0xf0] sm:$0xff]  ;;  %v239_v30 = vld [vmem:[#allocation3 + $0xf8] sm:$0xff] }
  0x24   :  { %2633 = vmatpush3.bf16.msra.mxu1 %v2632_v34  ;;  %2610 = vmatprep.subr.bf16.mxu0 %v3040_v0  ;;  %v103_v16 = vadd.f32 %v99_v58, %v87_v2  ;;  %v105_v17 = vadd.f32 %v101_v60, %v89_v3  ;;  %v165_v20 = vmul.f32 %v3182_v59, %v1749_v48  ;;  %v61_v31 = vld [vmem:[%s3448_s2] sm:$0xff]  ;;  %v394_v60 = vld [vmem:[#allocation3 + $0x100] sm:$0xff] }
  0x25   :  { %2634 = vmatprep.subr.bf16.mxu1 %v3040_v0  ;;  %v159_v23 = vadd.f32 %v155_v10, %v151_v18  ;;  %v179_v24 = vmul.f32 %v3193_v8, %v1751_v55  ;;  %v2617_v25 = vpack.c.bf16 %v237_v7, %v236_v6  ;;  %v2641_v26 = vpack.c.bf16 %v218_v14, %v217_v13  ;;  %v491_v13 = vld [vmem:[#allocation3 + $0x190] sm:$0xff]  ;;  %v492_v14 = vld [vmem:[#allocation3 + $0x198] sm:$0xff] }
  0x26   :  { %v119_v21 = vadd.f32 %v115_v61, %v103_v16  ;;  %v121_v22 = vadd.f32 %v117_v62, %v105_v17  ;;  %v161_v27 = vadd.f32 %v157_v11, %v153_v19  ;;  %v181_v28 = vmul.f32 %v3203_v15, %v1751_v55  ;;  %v395_v61 = vld [vmem:[#allocation3 + $0x108] sm:$0xff]  ;;  %v489_v62 = vld [vmem:[#allocation3 + $0x180] sm:$0xff]  ;;  %v396_v11 = vld [vmem:[#allocation3 + $0x110] sm:$0xff] }
  0x27   :  { %2612 = vmatpush3.bf16.msra.mxu0 %v2611_v39  ;;  %v167_v39 = vadd.f32 %v163_v12, %v159_v23  ;;  %v2647_v9 = vpack.c.bf16 %v395_v61, %v394_v60  ;;  %v397_v12 = vld [vmem:[#allocation3 + $0x118] sm:$0xff]  ;;  %v2674_v19 = vpack.c.bf16 %v492_v14, %v491_v13  ;;  %v494_v23 = vld [vmem:[#allocation3 + $0x1a8] sm:$0xff]  ;;  %v3240_v60 = vld [vmem:[#allocation3 + $0x200] sm:$0xff] }
  0x28   :  { %2636 = vmatpush3.bf16.msra.mxu1 %v2635_v40  ;;  %2613 = vmatprep.subr.bf16.mxu0 %v3040_v0  ;;  %v135_v32 = vadd.f32 %v131_v63, %v119_v21  ;;  %v137_v34 = vadd.f32 %v133_v4, %v121_v22  ;;  %v219_v40 = vld [vmem:[#allocation3 + $0x70] sm:$0xff]  ;;  %v169_v45 = vadd.f32 %v165_v20, %v161_v27  ;;  %v490_v63 = vld [vmem:[#allocation3 + $0x188] sm:$0xff]  ;;  %v398_v20 = vld [vmem:[#allocation3 + $0x120] sm:$0xff] }
  0x29   :  { %2637 = vmatprep.subr.bf16.mxu1 %v3040_v0  ;;  %v183_v47 = vadd.f32 %v179_v24, %v167_v39  ;;  %v2671_v10 = vpack.c.bf16 %v490_v63, %v489_v62  ;;  %v2650_v18 = vpack.c.bf16 %v397_v12, %v396_v11  ;;  %v399_v21 = vld [vmem:[#allocation3 + $0x128] sm:$0xff]  ;;  %v493_v22 = vld [vmem:[#allocation3 + $0x1a0] sm:$0xff]  ;;  %v401_v27 = vld [vmem:[#allocation3 + $0x138] sm:$0xff] }
  0x2a   :  { %v139_v46 = vadd.f32 %v135_v32, %v61_v31  ;;  %v141_v48 = vadd.f32 %v137_v34, %v61_v31  ;;  %v185_v49 = vadd.f32 %v181_v28, %v169_v45  ;;  %v2653_v24 = vpack.c.bf16 %v399_v21, %v398_v20  ;;  %v495_v28 = vld [vmem:[#allocation3 + $0x1b0] sm:$0xff]  ;;  %v402_v32 = vld [vmem:[#allocation3 + $0x140] sm:$0xff]  ;;  %v403_v34 = vld [vmem:[#allocation3 + $0x148] sm:$0xff] }
  0x2b   :  { %2615 = vmatpush3.bf16.msra.mxu0 %v2614_v41  ;;  %v220_v41 = vld [vmem:[#allocation3 + $0x78] sm:$0xff]  ;;  %v187_v51 = vadd.f32 %v183_v47, %v61_v31  ;;  %v497_v39 = vld [vmem:[#allocation3 + $0x1c0] sm:$0xff]  ;;  %v3242_v61 = vld [vmem:[#allocation3 + $0x208] sm:$0xff] }
  0x2c   :  { %2639 = vmatpush3.bf16.msra.mxu1 %v2638_v42  ;;  %2616 = vmatprep.subr.bf16.mxu0 %v3040_v0  ;;  %v2620_v42 = vpack.c.bf16 %v239_v30, %v238_v29  ;;  %v2644_v50 = vpack.c.bf16 %v220_v41, %v219_v40  ;;  %v189_v52 = vadd.f32 %v185_v49, %v61_v31  ;;  %v496_v29 = vld [vmem:[#allocation3 + $0x1b8] sm:$0xff]  ;;  %v498_v40 = vld [vmem:[#allocation3 + $0x1c8] sm:$0xff]  ;;  %v404_v41 = vld [vmem:[#allocation3 + $0x150] sm:$0xff] }
  0x2d   :  { %2640 = vmatprep.subr.bf16.mxu1 %v3040_v0  ;;  %v191_v55 = vmax.f32 %v139_v46, %v187_v51  ;;  %v2680_v31 = vpack.c.bf16 %v496_v29, %v495_v28  ;;  %v405_v45 = vld [vmem:[#allocation3 + $0x158] sm:$0xff]  ;;  %v2659_v46 = vpack.c.bf16 %v403_v34, %v402_v32  ;;  %v2683_v47 = vpack.c.bf16 %v498_v40, %v497_v39  ;;  %v406_v49 = vld [vmem:[#allocation3 + $0x160] sm:$0xff]  ;;  %v1746_v11 = vld [vmem:[%s3447_s1 + $0x18] sm:$0xff] }
  0x2e   :  { %v193_v56 = vmax.f32 %v141_v48, %v189_v52  ;;  %v500_v48 = vld [vmem:[#allocation3 + $0x1d8] sm:$0xff]  ;;  %v501_v51 = vld [vmem:[#allocation3 + $0x1e0] sm:$0xff]  ;;  %v502_v52 = vld [vmem:[#allocation3 + $0x1e8] sm:$0xff]  ;;  %v2662_v62 = vpack.c.bf16 %v405_v45, %v404_v41  ;;  %v148_v40 = vmul.f32 %v3129_v38, %v1746_v11  ;;  %v150_v41 = vmul.f32 %v3138_v43, %v1746_v11 }
  0x2f   :  { %2618 = vmatpush3.bf16.msra.mxu0 %v2617_v25  ;;  %v195_v57 = vmax.f32 %v191_v55, 0.0  ;;  %v2677_v25 = vpack.c.bf16 %v494_v23, %v493_v22  ;;  %v3232_v55 = vld [vmem:[#allocation3 + $0x170] sm:$0xff]  ;;  %v1748_v12 = vld [vmem:[%s3447_s1 + $0x28] sm:$0xff]  ;;  %v1750_v13 = vld [vmem:[%s3447_s1 + $0x38] sm:$0xff] }
  0x30   :  { %2642 = vmatpush3.bf16.msra.mxu1 %v2641_v26  ;;  %2619 = vmatprep.subr.bf16.mxu0 %v3040_v0  ;;  %v197_v58 = vmax.f32 %v193_v56, 0.0  ;;  %v400_v26 = vld [vmem:[#allocation3 + $0x130] sm:$0xff]  ;;  %v3234_v56 = vld [vmem:[#allocation3 + $0x178] sm:$0xff]  ;;  %v100_v21 = vmul.f32 %v3129_v38, %v1748_v12  ;;  %v102_v22 = vmul.f32 %v3138_v43, %v1748_v12  ;;  %v116_v23 = vmul.f32 %v3143_v44, %v1750_v13  ;;  %v680_v32 = vld [vmem:[#allocation3 + $0x288] sm:$0xff] }
  0x31   :  { %2643 = vmatprep.subr.bf16.mxu1 %v3040_v0  ;;  %199 = vst [vmem:[#allocation2] sm:$0xff] %v195_v57  ;;  %v2656_v30 = vpack.c.bf16 %v401_v27, %v400_v26  ;;  %v3236_v57 = vld [vmem:[#allocation3 + $0x1f0] sm:$0xff]  ;;  %v1752_v14 = vld [vmem:[%s3447_s1 + $0x48] sm:$0xff] }
  0x32   :  { %201 = vst [vmem:[#allocation2 + $0x10] sm:$0xff] %v197_v58  ;;  %v3238_v58 = vld [vmem:[#allocation3 + $0x1f8] sm:$0xff]  ;;  %v132_v26 = vmul.f32 %v3170_v54, %v1752_v14  ;;  %v134_v27 = vmul.f32 %v3182_v59, %v1752_v14 }
  0x33   :  { %2621 = vmatpush3.bf16.msra.mxu0 %v2620_v42  ;;  %v499_v42 = vld [vmem:[#allocation3 + $0x1d0] sm:$0xff] }
  0x34   :  { %2645 = vmatpush3.bf16.msra.mxu1 %v2644_v50  ;;  %2646 = vmatprep.subr.bf16.mxu0 %v3040_v0  ;;  %v407_v50 = vld [vmem:[#allocation3 + $0x168] sm:$0xff]  ;;  %v2686_v63 = vpack.c.bf16 %v500_v48, %v499_v42 }
  0x35   :  { %2670 = vmatprep.subr.bf16.mxu1 %v3040_v0 }
  0x38   :  { %v221_v2 = vld [vmem:[#allocation2 + $0x1] sm:$0x1]  ;;  %v203_v4 = vld [vmem:[#allocation2] sm:$0x1]  ;;  %v486_v45 = vld [vmem:[#allocation2 + $0x3] sm:$0x1] }
  0x39   :  { %v222_v3 = vld [vmem:[#allocation2 + $0x11] sm:$0x1]  ;;  %v204_v5 = vld [vmem:[#allocation2 + $0x10] sm:$0x1] }
  0x3a   :  { %v242_v6 = vrot.slane %v222_v3, 7  ;;  %v318_v7 = vrot.slane %v204_v5, 7  ;;  %v392_v3 = vld [vmem:[#allocation2 + $0x12] sm:$0x1]  ;;  %v2689_v5 = vpack.c.bf16 %v502_v52, %v501_v51 }
  0x3b   :  { %v412_v20 = vrot.slane %v392_v3, 7 }
  0x3c   :  { %v244_v16 = vsel %vm243_vm1, %v242_v6, %v221_v2  ;;  %v319_v17 = vsel %vm243_vm1, %v318_v7, %v203_v4  ;;  %v2665_v2 = vpack.c.bf16 %v407_v50, %v406_v49  ;;  %v487_v4 = vld [vmem:[#allocation2 + $0x13] sm:$0x1]  ;;  %v2668_v6 = vpack.c.bf16 %v3234_v56, %v3232_v55  ;;  %v587_v55 = vld [vmem:[#allocation3 + $0x218] sm:$0xff] }
  0x3d   :  { %2071 = vmatmul.mubr.f32.vlgmr.msra.gmra.mrb[0].mxu0 %v244_v16  ;;  %2106 = vmatmul.mubr.f32.vlgmr.msra.gmra.mrb[0].mxu1 %v319_v17  ;;  %v2692_v7 = vpack.c.bf16 %v3238_v58, %v3236_v57  ;;  %v166_v50 = vmul.f32 %v3182_v59, %v1750_v13  ;;  %v182_v58 = vmul.f32 %v3203_v15, %v1752_v14  ;;  %v682_v59 = vld [vmem:[#allocation3 + $0x298] sm:$0xff] }
  0x3e   :  { %2648 = vmatpush3.bf16.msra.mxu0 %v2647_v9  ;;  %2672 = vmatpush3.bf16.msra.mxu1 %v2671_v10  ;;  %v2695_v9 = vpack.c.bf16 %v3242_v61, %v3240_v60  ;;  %v48_v10 = vld [vmem:[%s3447_s1 + $0x8] sm:$0xff] }
  0x3f   :  { %2649 = vmatprep.subr.bf16.mxu0 %v3040_v0  ;;  %2673 = vmatprep.subr.bf16.mxu1 %v3040_v0  ;;  %v72_v16 = vmul.f32 %v3107_v33, %v48_v10  ;;  %v74_v17 = vmul.f32 %v3113_v35, %v48_v10  ;;  %v507_v33 = vrot.slane %v487_v4, 7  ;;  %v144_v28 = vmul.f32 %v3118_v36, %v48_v10 }
  0x40   :  { %2140 = vmatprep.mubr.msk.f32.mxu0 %vm3041_vm0, %v3042_v1  ;;  %2175 = vmatprep.mubr.msk.f32.mxu1 %vm3041_vm0, %v3042_v1  ;;  %v146_v29 = vmul.f32 %v3123_v37, %v48_v10 }
  0x41   :  { %v152_v48 = vadd.f32 %v148_v40, %v144_v28  ;;  %v508_v51 = vsel %vm243_vm1, %v507_v33, %v486_v45  ;;  %v597_v45 = vld [vmem:[#allocation3 + $0x268] sm:$0xff] }
  0x42   :  { %2651 = vmatpush3.bf16.msra.mxu0 %v2650_v18  ;;  %2675 = vmatpush3.bf16.msra.mxu1 %v2674_v19  ;;  %v84_v18 = vmul.f32 %v3118_v36, %v1746_v11  ;;  %v86_v19 = vmul.f32 %v3123_v37, %v1746_v11  ;;  %v164_v36 = vmul.f32 %v3170_v54, %v1750_v13  ;;  %v586_v54 = vld [vmem:[#allocation3 + $0x210] sm:$0xff]  ;;  %v589_v11 = vld [vmem:[#allocation3 + $0x228] sm:$0xff] }
  0x43   :  { %2652 = vmatprep.subr.bf16.mxu0 %v3040_v0  ;;  %2676 = vmatprep.subr.bf16.mxu1 %v3040_v0  ;;  %v154_v43 = vadd.f32 %v150_v41, %v146_v29  ;;  %v2698_v3 = vpack.c.bf16 %v587_v55, %v586_v54  ;;  %v596_v41 = vld [vmem:[#allocation3 + $0x260] sm:$0xff]  ;;  %v775_v54 = vld [vmem:[#allocation3 + $0x308] sm:$0xff] }
  0x44   :  { %v90_v35 = vadd.f32 %v86_v19, %v74_v17  ;;  %v590_v17 = vld [vmem:[#allocation3 + $0x230] sm:$0xff]  ;;  %v591_v19 = vld [vmem:[#allocation3 + $0x238] sm:$0xff] }
  0x45   :  { %v2704_v33 = vpack.c.bf16 %v591_v19, %v590_v17  ;;  %v876_v17 = vld [vmem:[#allocation3 + $0x3b8] sm:$0xff] }
  0x46   :  { %2654 = vmatpush3.bf16.msra.mxu0 %v2653_v24  ;;  %2678 = vmatpush3.bf16.msra.mxu1 %v2677_v25  ;;  %v88_v24 = vadd.f32 %v84_v18, %v72_v16  ;;  %v118_v25 = vmul.f32 %v3165_v53, %v1750_v13  ;;  %v106_v39 = vadd.f32 %v102_v22, %v90_v35  ;;  %v684_v13 = vld [vmem:[#allocation3 + $0x2a8] sm:$0xff]  ;;  %v592_v35 = vld [vmem:[#allocation3 + $0x240] sm:$0xff] }
  0x47   :  { %2655 = vmatprep.subr.bf16.mxu0 %v3040_v0  ;;  %2679 = vmatprep.subr.bf16.mxu1 %v3040_v0 }
  0x48   :  { %v104_v34 = vadd.f32 %v100_v21, %v88_v24  ;;  %v122_v42 = vadd.f32 %v118_v25, %v106_v39  ;;  %v686_v21 = vld [vmem:[#allocation3 + $0x2b8] sm:$0xff]  ;;  %v593_v25 = vld [vmem:[#allocation3 + $0x248] sm:$0xff] }
  0x49   :  { %v2707_v28 = vpack.c.bf16 %v593_v25, %v592_v35  ;;  %v784_v35 = vld [vmem:[#allocation3 + $0x350] sm:$0xff]  ;;  %v785_v25 = vld [vmem:[#allocation3 + $0x358] sm:$0xff] }
  0x4a   :  { %2657 = vmatpush3.bf16.msra.mxu0 %v2656_v30  ;;  %2681 = vmatpush3.bf16.msra.mxu1 %v2680_v31  ;;  %v391_v30 = vld [vmem:[#allocation2 + $0x2] sm:$0x1]  ;;  %v120_v37 = vadd.f32 %v116_v23, %v104_v34  ;;  %v138_v56 = vadd.f32 %v134_v27, %v122_v42  ;;  %v688_v27 = vld [vmem:[#allocation3 + $0x2c8] sm:$0xff]  ;;  %v690_v34 = vld [vmem:[#allocation3 + $0x2d8] sm:$0xff] }
  0x4b   :  { %2658 = vmatprep.subr.bf16.mxu0 %v3040_v0  ;;  %2682 = vmatprep.subr.bf16.mxu1 %v3040_v0  ;;  %v679_v31 = vld [vmem:[#allocation3 + $0x280] sm:$0xff]  ;;  %v413_v38 = vsel %vm243_vm1, %v412_v20, %v391_v30  ;;  %v685_v20 = vld [vmem:[#allocation3 + $0x2b0] sm:$0xff] }
  0x4c   :  { %v2719_v49 = vpack.c.bf16 %v680_v32, %v679_v31  ;;  %v2728_v24 = vpack.c.bf16 %v686_v21, %v685_v20  ;;  %v594_v30 = vld [vmem:[#allocation3 + $0x250] sm:$0xff]  ;;  %v595_v31 = vld [vmem:[#allocation3 + $0x258] sm:$0xff]  ;;  %v782_v20 = vld [vmem:[#allocation3 + $0x340] sm:$0xff] }
  0x4d   :  { %v689_v32 = vld [vmem:[#allocation3 + $0x2d0] sm:$0xff]  ;;  %v2710_v39 = vpack.c.bf16 %v595_v31, %v594_v30  ;;  %v783_v21 = vld [vmem:[#allocation3 + $0x348] sm:$0xff]  ;;  %v786_v30 = vld [vmem:[#allocation3 + $0x360] sm:$0xff] }
  0x4e   :  { %2660 = vmatpush3.bf16.msra.mxu0 %v2659_v46  ;;  %2684 = vmatpush3.bf16.msra.mxu1 %v2683_v47  ;;  %v156_v46 = vmul.f32 %v3143_v44, %v1748_v12  ;;  %v158_v47 = vmul.f32 %v3165_v53, %v1748_v12  ;;  %v136_v44 = vadd.f32 %v132_v26, %v120_v37  ;;  %v683_v12 = vld [vmem:[#allocation3 + $0x2a0] sm:$0xff]  ;;  %v598_v42 = vld [vmem:[#allocation3 + $0x270] sm:$0xff]  ;;  %v787_v31 = vld [vmem:[#allocation3 + $0x368] sm:$0xff] }
  0x4f   :  { %2661 = vmatprep.subr.bf16.mxu0 %v3040_v0  ;;  %2685 = vmatprep.subr.bf16.mxu1 %v3040_v0  ;;  %v180_v53 = vmul.f32 %v3193_v8, %v1752_v14  ;;  %v2725_v16 = vpack.c.bf16 %v684_v13, %v683_v12  ;;  %v687_v26 = vld [vmem:[#allocation3 + $0x2c0] sm:$0xff]  ;;  %v2734_v40 = vpack.c.bf16 %v690_v34, %v689_v32  ;;  %v874_v13 = vld [vmem:[#allocation3 + $0x3a8] sm:$0xff] }
  0x50   :  { %v160_v52 = vadd.f32 %v156_v46, %v152_v48  ;;  %v162_v57 = vadd.f32 %v158_v47, %v154_v43  ;;  %v2731_v29 = vpack.c.bf16 %v688_v27, %v687_v26  ;;  %v691_v46 = vld [vmem:[#allocation3 + $0x2e0] sm:$0xff]  ;;  %v692_v47 = vld [vmem:[#allocation3 + $0x2e8] sm:$0xff]  ;;  %v599_v48 = vld [vmem:[#allocation3 + $0x278] sm:$0xff] }
  0x51   :  { %v2737_v37 = vpack.c.bf16 %v692_v47, %v691_v46  ;;  %v582_v43 = vld [vmem:[#allocation2 + $0x14] sm:$0x1]  ;;  %v873_v12 = vld [vmem:[#allocation3 + $0x3a0] sm:$0xff]  ;;  %v880_v27 = vld [vmem:[#allocation3 + $0x3d8] sm:$0xff] }
  0x52   :  { %2663 = vmatpush3.bf16.msra.mxu0 %v2662_v62  ;;  %2687 = vmatpush3.bf16.msra.mxu1 %v2686_v63  ;;  %v681_v62 = vld [vmem:[#allocation3 + $0x290] sm:$0xff]  ;;  %v62_v63 = vld [vmem:[%s3448_s2 + $0x8] sm:$0xff]  ;;  %v170_v8 = vadd.f32 %v166_v50, %v162_v57  ;;  %v581_v57 = vld [vmem:[#allocation2 + $0x4] sm:$0x1] }
  0x53   :  { %2664 = vmatprep.subr.bf16.mxu0 %v3040_v0  ;;  %2688 = vmatprep.subr.bf16.mxu1 %v3040_v0  ;;  %v140_v4 = vadd.f32 %v136_v44, %v62_v63  ;;  %v2722_v15 = vpack.c.bf16 %v682_v59, %v681_v62  ;;  %v677_v50 = vld [vmem:[#allocation2 + $0x15] sm:$0x1]  ;;  %v870_v62 = vld [vmem:[#allocation3 + $0x388] sm:$0xff]  ;;  %v881_v32 = vld [vmem:[#allocation3 + $0x3e0] sm:$0xff] }
  0x54   :  { %v186_v10 = vadd.f32 %v182_v58, %v170_v8  ;;  %v697_v55 = vrot.slane %v677_v50, 7  ;;  %v676_v58 = vld [vmem:[#allocation2 + $0x5] sm:$0x1]  ;;  %v879_v26 = vld [vmem:[#allocation3 + $0x3d0] sm:$0xff]  ;;  %v882_v34 = vld [vmem:[#allocation3 + $0x3e8] sm:$0xff] }
  0x55   :  { %v883_v46 = vld [vmem:[#allocation3 + $0x3f0] sm:$0xff]  ;;  %v884_v47 = vld [vmem:[#allocation3 + $0x3f8] sm:$0xff]  ;;  %v965_v50 = vld [vmem:[#allocation3 + $0x408] sm:$0xff] }
  0x56   :  { %2666 = vmatpush3.bf16.msra.mxu0 %v2665_v2  ;;  %2690 = vmatpush3.bf16.msra.mxu1 %v2689_v5  ;;  %v168_v2 = vadd.f32 %v164_v36, %v160_v52  ;;  %v190_v60 = vadd.f32 %v186_v10, %v62_v63  ;;  %v2713_v36 = vpack.c.bf16 %v597_v45, %v596_v41  ;;  %v602_v52 = vrot.slane %v582_v43, 7  ;;  %v778_v10 = vld [vmem:[#allocation3 + $0x320] sm:$0xff]  ;;  %v788_v41 = vld [vmem:[#allocation3 + $0x370] sm:$0xff]  ;;  %v789_v45 = vld [vmem:[#allocation3 + $0x378] sm:$0xff] }
  0x57   :  { %2667 = vmatprep.subr.bf16.mxu0 %v3040_v0  ;;  %2691 = vmatprep.subr.bf16.mxu1 %v3040_v0  ;;  %v964_v43 = vld [vmem:[#allocation3 + $0x400] sm:$0xff] }
  0x58   :  { %v184_v5 = vadd.f32 %v180_v53, %v168_v2  ;;  %v774_v53 = vld [vmem:[#allocation3 + $0x300] sm:$0xff]  ;;  %v698_v2 = vsel %vm243_vm1, %v697_v55, %v676_v58  ;;  %v966_v58 = vld [vmem:[#allocation3 + $0x410] sm:$0xff] }
  0x59   :  { %v2743_v59 = vpack.c.bf16 %v775_v54, %v774_v53  ;;  %v1060_v53 = vld [vmem:[#allocation3 + $0x488] sm:$0xff]  ;;  %v2791_v54 = vpack.c.bf16 %v965_v50, %v964_v43 }
  0x5a   :  { %2669 = vmatpush3.bf16.msra.mxu0 %v2668_v6  ;;  %2693 = vmatpush3.bf16.msra.mxu1 %v2692_v7  ;;  %v588_v6 = vld [vmem:[#allocation3 + $0x220] sm:$0xff]  ;;  %v142_v7 = vadd.f32 %v138_v56, %v62_v63  ;;  %v188_v14 = vadd.f32 %v184_v5, %v62_v63  ;;  %v603_v63 = vsel %vm243_vm1, %v602_v52, %v581_v57  ;;  %v871_v5 = vld [vmem:[#allocation3 + $0x390] sm:$0xff] }
  0x5b   :  { %2694 = vmatprep.subr.bf16.mxu0 %v3040_v0  ;;  %2718 = vmatprep.subr.bf16.mxu1 %v3040_v0  ;;  %v869_v56 = vld [vmem:[#allocation3 + $0x380] sm:$0xff] }
  0x5c   :  { %v192_v61 = vmax.f32 %v140_v4, %v188_v14  ;;  %v194_v18 = vmax.f32 %v142_v7, %v190_v60  ;;  %v2767_v8 = vpack.c.bf16 %v870_v62, %v869_v56  ;;  %v777_v4 = vld [vmem:[#allocation3 + $0x318] sm:$0xff]  ;;  %v2773_v60 = vpack.c.bf16 %v874_v13, %v873_v12  ;;  %v1059_v52 = vld [vmem:[#allocation3 + $0x480] sm:$0xff]  ;;  %v1065_v12 = vld [vmem:[#allocation3 + $0x4b0] sm:$0xff] }
  0x5d   :  { %2141 = vmatmul.mubr.f32.vlgmr.msra.gmra.mrb[2].mxu0 %v413_v38  ;;  %2176 = vmatmul.mubr.f32.vlgmr.msra.gmra.mrb[2].mxu1 %v508_v51  ;;  %v693_v38 = vld [vmem:[#allocation3 + $0x2f0] sm:$0xff]  ;;  %v2716_v51 = vpack.c.bf16 %v599_v48, %v598_v42  ;;  %v2764_v42 = vpack.c.bf16 %v789_v45, %v788_v41  ;;  %v2788_v48 = vpack.c.bf16 %v884_v47, %v883_v46  ;;  %v967_v62 = vld [vmem:[#allocation3 + $0x418] sm:$0xff]  ;;  %v1154_v47 = vld [vmem:[#allocation3 + $0x500] sm:$0xff] }
  0x5e   :  { %2696 = vmatpush3.bf16.msra.mxu0 %v2695_v9  ;;  %2720 = vmatpush3.bf16.msra.mxu1 %v2719_v49  ;;  %v2701_v9 = vpack.c.bf16 %v589_v11, %v588_v6  ;;  %v196_v22 = vmax.f32 %v192_v61, 0.0  ;;  %v198_v23 = vmax.f32 %v194_v18, 0.0  ;;  %v694_v49 = vld [vmem:[#allocation3 + $0x2f8] sm:$0xff]  ;;  %v779_v11 = vld [vmem:[#allocation3 + $0x328] sm:$0xff]  ;;  %v780_v61 = vld [vmem:[#allocation3 + $0x330] sm:$0xff]  ;;  %v2815_v57 = vpack.c.bf16 %v1060_v53, %v1059_v52 }
  0x5f   :  { %2697 = vmatprep.subr.bf16.mxu0 %v3040_v0  ;;  %2721 = vmatprep.subr.bf16.mxu1 %v3040_v0  ;;  %v2740_v44 = vpack.c.bf16 %v694_v49, %v693_v38  ;;  %v2749_v14 = vpack.c.bf16 %v779_v11, %v778_v10  ;;  %v771_v38 = vld [vmem:[#allocation2 + $0x6] sm:$0x1]  ;;  %v970_v10 = vld [vmem:[#allocation3 + $0x430] sm:$0xff]  ;;  %v971_v11 = vld [vmem:[#allocation3 + $0x438] sm:$0xff] }
  0x60   :  { %2210 = vmatprep.mubr.msk.f32.mxu0 %vm3041_vm0, %v3042_v1  ;;  %2245 = vmatprep.mubr.msk.f32.mxu1 %vm3041_vm0, %v3042_v1  ;;  %200 = vst [vmem:[#allocation2 + $0x8] sm:$0xff] %v196_v22  ;;  %202 = vst [vmem:[#allocation2 + $0x18] sm:$0xff] %v198_v23  ;;  %v877_v22 = vld [vmem:[#allocation3 + $0x3c0] sm:$0xff]  ;;  %v878_v23 = vld [vmem:[#allocation3 + $0x3c8] sm:$0xff] }
  0x61   :  { %v1066_v13 = vld [vmem:[#allocation3 + $0x4b8] sm:$0xff]  ;;  %v1156_v52 = vld [vmem:[#allocation3 + $0x510] sm:$0xff] }
  0x62   :  { %2699 = vmatpush3.bf16.msra.mxu0 %v2698_v3  ;;  %2723 = vmatpush3.bf16.msra.mxu1 %v2722_v15  ;;  %v776_v3 = vld [vmem:[#allocation3 + $0x310] sm:$0xff]  ;;  %v872_v15 = vld [vmem:[#allocation3 + $0x398] sm:$0xff] }
  0x63   :  { %2700 = vmatprep.subr.bf16.mxu0 %v3040_v0  ;;  %2724 = vmatprep.subr.bf16.mxu1 %v3040_v0  ;;  %v2746_v6 = vpack.c.bf16 %v777_v4, %v776_v3  ;;  %v2770_v7 = vpack.c.bf16 %v872_v15, %v871_v5  ;;  %v968_v3 = vld [vmem:[#allocation3 + $0x420] sm:$0xff]  ;;  %v969_v4 = vld [vmem:[#allocation3 + $0x428] sm:$0xff]  ;;  %v1157_v53 = vld [vmem:[#allocation3 + $0x518] sm:$0xff] }
  0x64   :  { %v1063_v5 = vld [vmem:[#allocation3 + $0x4a0] sm:$0xff]  ;;  %v1064_v15 = vld [vmem:[#allocation3 + $0x4a8] sm:$0xff] }
  0x66   :  { %2702 = vmatpush3.bf16.msra.mxu0 %v2701_v9  ;;  %2726 = vmatpush3.bf16.msra.mxu1 %v2725_v16  ;;  %v781_v9 = vld [vmem:[#allocation3 + $0x338] sm:$0xff]  ;;  %v875_v16 = vld [vmem:[#allocation3 + $0x3b0] sm:$0xff] }
  0x67   :  { %2703 = vmatprep.subr.bf16.mxu0 %v3040_v0  ;;  %2727 = vmatprep.subr.bf16.mxu1 %v3040_v0  ;;  %v2752_v18 = vpack.c.bf16 %v781_v9, %v780_v61  ;;  %v2776_v19 = vpack.c.bf16 %v876_v17, %v875_v16  ;;  %v972_v61 = vld [vmem:[#allocation3 + $0x440] sm:$0xff]  ;;  %v973_v9 = vld [vmem:[#allocation3 + $0x448] sm:$0xff] }
  0x68   :  { %v1067_v16 = vld [vmem:[#allocation3 + $0x4c0] sm:$0xff]  ;;  %v1068_v17 = vld [vmem:[#allocation3 + $0x4c8] sm:$0xff] }
  0x6a   :  { %2705 = vmatpush3.bf16.msra.mxu0 %v2704_v33  ;;  %2729 = vmatpush3.bf16.msra.mxu1 %v2728_v24  ;;  %v2755_v33 = vpack.c.bf16 %v783_v21, %v782_v20  ;;  %v2779_v24 = vpack.c.bf16 %v878_v23, %v877_v22  ;;  %v974_v20 = vld [vmem:[#allocation3 + $0x450] sm:$0xff]  ;;  %v975_v21 = vld [vmem:[#allocation3 + $0x458] sm:$0xff] }
  0x6b   :  { %2706 = vmatprep.subr.bf16.mxu0 %v3040_v0  ;;  %2730 = vmatprep.subr.bf16.mxu1 %v3040_v0  ;;  %v1069_v22 = vld [vmem:[#allocation3 + $0x4d0] sm:$0xff]  ;;  %v1070_v23 = vld [vmem:[#allocation3 + $0x4d8] sm:$0xff] }
  0x6e   :  { %2708 = vmatpush3.bf16.msra.mxu0 %v2707_v28  ;;  %2732 = vmatpush3.bf16.msra.mxu1 %v2731_v29  ;;  %v2758_v28 = vpack.c.bf16 %v785_v25, %v784_v35  ;;  %v2782_v29 = vpack.c.bf16 %v880_v27, %v879_v26  ;;  %v976_v35 = vld [vmem:[#allocation3 + $0x460] sm:$0xff]  ;;  %v977_v25 = vld [vmem:[#allocation3 + $0x468] sm:$0xff] }
  0x6f   :  { %2709 = vmatprep.subr.bf16.mxu0 %v3040_v0  ;;  %2733 = vmatprep.subr.bf16.mxu1 %v3040_v0  ;;  %v1071_v26 = vld [vmem:[#allocation3 + $0x4e0] sm:$0xff]  ;;  %v1072_v27 = vld [vmem:[#allocation3 + $0x4e8] sm:$0xff] }
  0x72   :  { %2711 = vmatpush3.bf16.msra.mxu0 %v2710_v39  ;;  %2735 = vmatpush3.bf16.msra.mxu1 %v2734_v40  ;;  %v2761_v39 = vpack.c.bf16 %v787_v31, %v786_v30  ;;  %v2785_v40 = vpack.c.bf16 %v882_v34, %v881_v32  ;;  %v978_v30 = vld [vmem:[#allocation3 + $0x470] sm:$0xff]  ;;  %v979_v31 = vld [vmem:[#allocation3 + $0x478] sm:$0xff] }
  0x73   :  { %2712 = vmatprep.subr.bf16.mxu0 %v3040_v0  ;;  %2736 = vmatprep.subr.bf16.mxu1 %v3040_v0  ;;  %v1073_v32 = vld [vmem:[#allocation3 + $0x4f0] sm:$0xff]  ;;  %v1074_v34 = vld [vmem:[#allocation3 + $0x4f8] sm:$0xff]  ;;  %v2812_v41 = vpack.c.bf16 %v979_v31, %v978_v30 }
  0x74   :  { %v2836_v45 = vpack.c.bf16 %v1074_v34, %v1073_v32  ;;  %v1344_v34 = vld [vmem:[#allocation3 + $0x600] sm:$0xff] }
  0x76   :  { %2714 = vmatpush3.bf16.msra.mxu0 %v2713_v36  ;;  %2738 = vmatpush3.bf16.msra.mxu1 %v2737_v37  ;;  %v772_v36 = vld [vmem:[#allocation2 + $0x16] sm:$0x1]  ;;  %v867_v37 = vld [vmem:[#allocation2 + $0x17] sm:$0x1] }
  0x77   :  { %2715 = vmatprep.subr.bf16.mxu0 %v3040_v0  ;;  %2739 = vmatprep.subr.bf16.mxu1 %v3040_v0  ;;  %v792_v49 = vrot.slane %v772_v36, 7  ;;  %v1155_v36 = vld [vmem:[#allocation3 + $0x508] sm:$0xff] }
  0x78   :  { %v2839_v43 = vpack.c.bf16 %v1155_v36, %v1154_v47  ;;  %v1440_v47 = vld [vmem:[#allocation3 + $0x688] sm:$0xff] }
  0x79   :  { %v793_v55 = vsel %vm243_vm1, %v792_v49, %v771_v38  ;;  %v1056_v38 = vld [vmem:[#allocation2 + $0x9] sm:$0x1] }
  0x7a   :  { %2717 = vmatpush3.bf16.msra.mxu0 %v2716_v51  ;;  %2741 = vmatpush3.bf16.msra.mxu1 %v2740_v44  ;;  %v887_v51 = vrot.slane %v867_v37, 7  ;;  %v866_v44 = vld [vmem:[#allocation2 + $0x7] sm:$0x1]  ;;  %v1250_v49 = vld [vmem:[#allocation3 + $0x588] sm:$0xff] }
  0x7b   :  { %2742 = vmatprep.subr.bf16.mxu0 %v3040_v0  ;;  %2766 = vmatprep.subr.bf16.mxu1 %v3040_v0 }
  0x7c   :  { %v888_v56 = vsel %vm243_vm1, %v887_v51, %v866_v44 }
  0x7d   :  { %2211 = vmatmul.mubr.f32.vlgmr.msra.gmra.mrb[4].mxu0 %v603_v63  ;;  %2246 = vmatmul.mubr.f32.vlgmr.msra.gmra.mrb[4].mxu1 %v698_v2  ;;  %v1062_v63 = vld [vmem:[#allocation3 + $0x498] sm:$0xff]  ;;  %v2794_v2 = vpack.c.bf16 %v967_v62, %v966_v58  ;;  %v1158_v58 = vld [vmem:[#allocation3 + $0x520] sm:$0xff]  ;;  %v1159_v62 = vld [vmem:[#allocation3 + $0x528] sm:$0xff] }
  0x7e   :  { %2744 = vmatpush3.bf16.msra.mxu0 %v2743_v59  ;;  %2768 = vmatpush3.bf16.msra.mxu1 %v2767_v8  ;;  %v1061_v59 = vld [vmem:[#allocation3 + $0x490] sm:$0xff] }
  0x7f   :  { %2745 = vmatprep.subr.bf16.mxu0 %v3040_v0  ;;  %2769 = vmatprep.subr.bf16.mxu1 %v3040_v0  ;;  %v2818_v8 = vpack.c.bf16 %v1062_v63, %v1061_v59  ;;  %v1253_v59 = vld [vmem:[#allocation3 + $0x5a0] sm:$0xff]  ;;  %v1254_v63 = vld [vmem:[#allocation3 + $0x5a8] sm:$0xff] }
  0x80   :  { %2280 = vmatprep.mubr.msk.f32.mxu0 %vm3041_vm0, %v3042_v1  ;;  %2315 = vmatprep.mubr.msk.f32.mxu1 %vm3041_vm0, %v3042_v1 }
  0x82   :  { %2747 = vmatpush3.bf16.msra.mxu0 %v2746_v6  ;;  %2771 = vmatpush3.bf16.msra.mxu1 %v2770_v7  ;;  %v2797_v6 = vpack.c.bf16 %v969_v4, %v968_v3  ;;  %v2821_v7 = vpack.c.bf16 %v1064_v15, %v1063_v5  ;;  %v1160_v3 = vld [vmem:[#allocation3 + $0x530] sm:$0xff]  ;;  %v1161_v4 = vld [vmem:[#allocation3 + $0x538] sm:$0xff] }
  0x83   :  { %2748 = vmatprep.subr.bf16.mxu0 %v3040_v0  ;;  %2772 = vmatprep.subr.bf16.mxu1 %v3040_v0  ;;  %v1255_v5 = vld [vmem:[#allocation3 + $0x5b0] sm:$0xff]  ;;  %v1256_v15 = vld [vmem:[#allocation3 + $0x5b8] sm:$0xff] }
  0x86   :  { %2750 = vmatpush3.bf16.msra.mxu0 %v2749_v14  ;;  %2774 = vmatpush3.bf16.msra.mxu1 %v2773_v60  ;;  %v2800_v14 = vpack.c.bf16 %v971_v11, %v970_v10  ;;  %v2824_v60 = vpack.c.bf16 %v1066_v13, %v1065_v12  ;;  %v1162_v10 = vld [vmem:[#allocation3 + $0x540] sm:$0xff]  ;;  %v1163_v11 = vld [vmem:[#allocation3 + $0x548] sm:$0xff] }
  0x87   :  { %2751 = vmatprep.subr.bf16.mxu0 %v3040_v0  ;;  %2775 = vmatprep.subr.bf16.mxu1 %v3040_v0  ;;  %v1257_v12 = vld [vmem:[#allocation3 + $0x5c0] sm:$0xff]  ;;  %v1258_v13 = vld [vmem:[#allocation3 + $0x5c8] sm:$0xff] }
  0x8a   :  { %2753 = vmatpush3.bf16.msra.mxu0 %v2752_v18  ;;  %2777 = vmatpush3.bf16.msra.mxu1 %v2776_v19  ;;  %v2803_v18 = vpack.c.bf16 %v973_v9, %v972_v61  ;;  %v2827_v19 = vpack.c.bf16 %v1068_v17, %v1067_v16  ;;  %v1164_v61 = vld [vmem:[#allocation3 + $0x550] sm:$0xff]  ;;  %v1165_v9 = vld [vmem:[#allocation3 + $0x558] sm:$0xff] }
  0x8b   :  { %2754 = vmatprep.subr.bf16.mxu0 %v3040_v0  ;;  %2778 = vmatprep.subr.bf16.mxu1 %v3040_v0  ;;  %v1259_v16 = vld [vmem:[#allocation3 + $0x5d0] sm:$0xff]  ;;  %v1260_v17 = vld [vmem:[#allocation3 + $0x5d8] sm:$0xff] }
  0x8e   :  { %2756 = vmatpush3.bf16.msra.mxu0 %v2755_v33  ;;  %2780 = vmatpush3.bf16.msra.mxu1 %v2779_v24  ;;  %v2806_v33 = vpack.c.bf16 %v975_v21, %v974_v20  ;;  %v2830_v24 = vpack.c.bf16 %v1070_v23, %v1069_v22  ;;  %v1166_v20 = vld [vmem:[#allocation3 + $0x560] sm:$0xff]  ;;  %v1167_v21 = vld [vmem:[#allocation3 + $0x568] sm:$0xff] }
  0x8f   :  { %2757 = vmatprep.subr.bf16.mxu0 %v3040_v0  ;;  %2781 = vmatprep.subr.bf16.mxu1 %v3040_v0  ;;  %v1261_v22 = vld [vmem:[#allocation3 + $0x5e0] sm:$0xff]  ;;  %v1262_v23 = vld [vmem:[#allocation3 + $0x5e8] sm:$0xff] }
  0x92   :  { %2759 = vmatpush3.bf16.msra.mxu0 %v2758_v28  ;;  %2783 = vmatpush3.bf16.msra.mxu1 %v2782_v29  ;;  %v2809_v28 = vpack.c.bf16 %v977_v25, %v976_v35  ;;  %v2833_v29 = vpack.c.bf16 %v1072_v27, %v1071_v26  ;;  %v1168_v35 = vld [vmem:[#allocation3 + $0x570] sm:$0xff]  ;;  %v1169_v25 = vld [vmem:[#allocation3 + $0x578] sm:$0xff] }
  0x93   :  { %2760 = vmatprep.subr.bf16.mxu0 %v3040_v0  ;;  %2784 = vmatprep.subr.bf16.mxu1 %v3040_v0  ;;  %v1263_v26 = vld [vmem:[#allocation3 + $0x5f0] sm:$0xff]  ;;  %v1264_v27 = vld [vmem:[#allocation3 + $0x5f8] sm:$0xff]  ;;  %v2860_v30 = vpack.c.bf16 %v1169_v25, %v1168_v35 }
  0x94   :  { %v2884_v31 = vpack.c.bf16 %v1264_v27, %v1263_v26  ;;  %v1341_v27 = vld [vmem:[#allocation2 + $0xc] sm:$0x1] }
  0x96   :  { %2762 = vmatpush3.bf16.msra.mxu0 %v2761_v39  ;;  %2786 = vmatpush3.bf16.msra.mxu1 %v2785_v40  ;;  %v962_v39 = vld [vmem:[#allocation2 + $0x18] sm:$0x1]  ;;  %v1057_v40 = vld [vmem:[#allocation2 + $0x19] sm:$0x1] }
  0x97   :  { %2763 = vmatprep.subr.bf16.mxu0 %v3040_v0  ;;  %2787 = vmatprep.subr.bf16.mxu1 %v3040_v0  ;;  %v982_v46 = vrot.slane %v962_v39, 7  ;;  %v1077_v37 = vrot.slane %v1057_v40, 7  ;;  %v1345_v39 = vld [vmem:[#allocation3 + $0x608] sm:$0xff] }
  0x98   :  { %v2887_v36 = vpack.c.bf16 %v1345_v39, %v1344_v34  ;;  %v1630_v34 = vld [vmem:[#allocation3 + $0x788] sm:$0xff] }
  0x99   :  { %v1078_v51 = vsel %vm243_vm1, %v1077_v37, %v1056_v38  ;;  %v1346_v38 = vld [vmem:[#allocation3 + $0x610] sm:$0xff] }
  0x9a   :  { %2765 = vmatpush3.bf16.msra.mxu0 %v2764_v42  ;;  %2789 = vmatpush3.bf16.msra.mxu1 %v2788_v48  ;;  %v1249_v42 = vld [vmem:[#allocation3 + $0x580] sm:$0xff]  ;;  %v961_v48 = vld [vmem:[#allocation2 + $0x8] sm:$0x1] }
  0x9b   :  { %2790 = vmatprep.subr.bf16.mxu0 %v3040_v0  ;;  %2814 = vmatprep.subr.bf16.mxu1 %v3040_v0  ;;  %v983_v50 = vsel %vm243_vm1, %v982_v46, %v961_v48  ;;  %v2863_v44 = vpack.c.bf16 %v1250_v49, %v1249_v42  ;;  %v1246_v46 = vld [vmem:[#allocation2 + $0xb] sm:$0x1]  ;;  %v1347_v49 = vld [vmem:[#allocation3 + $0x618] sm:$0xff] }
  0x9d   :  { %2281 = vmatmul.mubr.f32.vlgmr.msra.gmra.mrb[6].mxu0 %v793_v55  ;;  %2316 = vmatmul.mubr.f32.vlgmr.msra.gmra.mrb[6].mxu1 %v888_v56  ;;  %v1252_v55 = vld [vmem:[#allocation3 + $0x598] sm:$0xff]  ;;  %v2842_v56 = vpack.c.bf16 %v1157_v53, %v1156_v52  ;;  %v1348_v52 = vld [vmem:[#allocation3 + $0x620] sm:$0xff]  ;;  %v1349_v53 = vld [vmem:[#allocation3 + $0x628] sm:$0xff] }
  0x9e   :  { %2792 = vmatpush3.bf16.msra.mxu0 %v2791_v54  ;;  %2816 = vmatpush3.bf16.msra.mxu1 %v2815_v57  ;;  %v1251_v54 = vld [vmem:[#allocation3 + $0x590] sm:$0xff] }
  0x9f   :  { %2793 = vmatprep.subr.bf16.mxu0 %v3040_v0  ;;  %2817 = vmatprep.subr.bf16.mxu1 %v3040_v0  ;;  %v2866_v57 = vpack.c.bf16 %v1252_v55, %v1251_v54  ;;  %v1443_v54 = vld [vmem:[#allocation3 + $0x6a0] sm:$0xff]  ;;  %v1444_v55 = vld [vmem:[#allocation3 + $0x6a8] sm:$0xff] }
  0xa0   :  { %2350 = vmatprep.mubr.msk.f32.mxu0 %vm3041_vm0, %v3042_v1  ;;  %2385 = vmatprep.mubr.msk.f32.mxu1 %vm3041_vm0, %v3042_v1 }
  0xa2   :  { %2795 = vmatpush3.bf16.msra.mxu0 %v2794_v2  ;;  %2819 = vmatpush3.bf16.msra.mxu1 %v2818_v8  ;;  %v2845_v2 = vpack.c.bf16 %v1159_v62, %v1158_v58  ;;  %v2869_v8 = vpack.c.bf16 %v1254_v63, %v1253_v59  ;;  %v1350_v58 = vld [vmem:[#allocation3 + $0x630] sm:$0xff]  ;;  %v1351_v62 = vld [vmem:[#allocation3 + $0x638] sm:$0xff] }
  0xa3   :  { %2796 = vmatprep.subr.bf16.mxu0 %v3040_v0  ;;  %2820 = vmatprep.subr.bf16.mxu1 %v3040_v0  ;;  %v1445_v59 = vld [vmem:[#allocation3 + $0x6b0] sm:$0xff]  ;;  %v1446_v63 = vld [vmem:[#allocation3 + $0x6b8] sm:$0xff] }
  0xa6   :  { %2798 = vmatpush3.bf16.msra.mxu0 %v2797_v6  ;;  %2822 = vmatpush3.bf16.msra.mxu1 %v2821_v7  ;;  %v2848_v6 = vpack.c.bf16 %v1161_v4, %v1160_v3  ;;  %v2872_v7 = vpack.c.bf16 %v1256_v15, %v1255_v5  ;;  %v1352_v3 = vld [vmem:[#allocation3 + $0x640] sm:$0xff]  ;;  %v1353_v4 = vld [vmem:[#allocation3 + $0x648] sm:$0xff] }
  0xa7   :  { %2799 = vmatprep.subr.bf16.mxu0 %v3040_v0  ;;  %2823 = vmatprep.subr.bf16.mxu1 %v3040_v0  ;;  %v1447_v5 = vld [vmem:[#allocation3 + $0x6c0] sm:$0xff]  ;;  %v1448_v15 = vld [vmem:[#allocation3 + $0x6c8] sm:$0xff] }
  0xaa   :  { %2801 = vmatpush3.bf16.msra.mxu0 %v2800_v14  ;;  %2825 = vmatpush3.bf16.msra.mxu1 %v2824_v60  ;;  %v2851_v14 = vpack.c.bf16 %v1163_v11, %v1162_v10  ;;  %v2875_v60 = vpack.c.bf16 %v1258_v13, %v1257_v12  ;;  %v1354_v10 = vld [vmem:[#allocation3 + $0x650] sm:$0xff]  ;;  %v1355_v11 = vld [vmem:[#allocation3 + $0x658] sm:$0xff] }
  0xab   :  { %2802 = vmatprep.subr.bf16.mxu0 %v3040_v0  ;;  %2826 = vmatprep.subr.bf16.mxu1 %v3040_v0  ;;  %v1449_v12 = vld [vmem:[#allocation3 + $0x6d0] sm:$0xff]  ;;  %v1450_v13 = vld [vmem:[#allocation3 + $0x6d8] sm:$0xff] }
  0xae   :  { %2804 = vmatpush3.bf16.msra.mxu0 %v2803_v18  ;;  %2828 = vmatpush3.bf16.msra.mxu1 %v2827_v19  ;;  %v2854_v18 = vpack.c.bf16 %v1165_v9, %v1164_v61  ;;  %v2878_v19 = vpack.c.bf16 %v1260_v17, %v1259_v16  ;;  %v1356_v61 = vld [vmem:[#allocation3 + $0x660] sm:$0xff]  ;;  %v1357_v9 = vld [vmem:[#allocation3 + $0x668] sm:$0xff] }
  0xaf   :  { %2805 = vmatprep.subr.bf16.mxu0 %v3040_v0  ;;  %2829 = vmatprep.subr.bf16.mxu1 %v3040_v0  ;;  %v1451_v16 = vld [vmem:[#allocation3 + $0x6e0] sm:$0xff]  ;;  %v1452_v17 = vld [vmem:[#allocation3 + $0x6e8] sm:$0xff] }
  0xb2   :  { %2807 = vmatpush3.bf16.msra.mxu0 %v2806_v33  ;;  %2831 = vmatpush3.bf16.msra.mxu1 %v2830_v24  ;;  %v2857_v33 = vpack.c.bf16 %v1167_v21, %v1166_v20  ;;  %v2881_v24 = vpack.c.bf16 %v1262_v23, %v1261_v22  ;;  %v1358_v20 = vld [vmem:[#allocation3 + $0x670] sm:$0xff]  ;;  %v1359_v21 = vld [vmem:[#allocation3 + $0x678] sm:$0xff] }
  0xb3   :  { %2808 = vmatprep.subr.bf16.mxu0 %v3040_v0  ;;  %2832 = vmatprep.subr.bf16.mxu1 %v3040_v0  ;;  %v1342_v22 = vld [vmem:[#allocation2 + $0x1c] sm:$0x1]  ;;  %v1453_v23 = vld [vmem:[#allocation3 + $0x6f0] sm:$0xff]  ;;  %v2908_v25 = vpack.c.bf16 %v1359_v21, %v1358_v20 }
  0xb4   :  { %v1362_v35 = vrot.slane %v1342_v22, 7  ;;  %v1643_v20 = vld [vmem:[#allocation3 + $0x7f0] sm:$0xff]  ;;  %v1644_v21 = vld [vmem:[#allocation3 + $0x7f8] sm:$0xff] }
  0xb5   :  { %v1532_v22 = vld [vmem:[#allocation2 + $0x1e] sm:$0x1] }
  0xb6   :  { %2810 = vmatpush3.bf16.msra.mxu0 %v2809_v28  ;;  %2834 = vmatpush3.bf16.msra.mxu1 %v2833_v29  ;;  %v1152_v28 = vld [vmem:[#allocation2 + $0x1a] sm:$0x1]  ;;  %v1247_v29 = vld [vmem:[#allocation2 + $0x1b] sm:$0x1]  ;;  %v1363_v39 = vsel %vm243_vm1, %v1362_v35, %v1341_v27  ;;  %v1552_v35 = vrot.slane %v1532_v22, 7 }
  0xb7   :  { %2811 = vmatprep.subr.bf16.mxu0 %v3040_v0  ;;  %2835 = vmatprep.subr.bf16.mxu1 %v3040_v0  ;;  %v1172_v32 = vrot.slane %v1152_v28, 7  ;;  %v1267_v40 = vrot.slane %v1247_v29, 7  ;;  %v1534_v28 = vld [vmem:[#allocation3 + $0x700] sm:$0xff]  ;;  %v1535_v29 = vld [vmem:[#allocation3 + $0x708] sm:$0xff] }
  0xb8   :  { %v1626_v27 = vld [vmem:[#allocation2 + $0xf] sm:$0x1] }
  0xb9   :  { %v1268_v42 = vsel %vm243_vm1, %v1267_v40, %v1246_v46  ;;  %v2935_v40 = vpack.c.bf16 %v1535_v29, %v1534_v28  ;;  %v1536_v46 = vld [vmem:[#allocation3 + $0x710] sm:$0xff] }
  0xba   :  { %2813 = vmatpush3.bf16.msra.mxu0 %v2812_v41  ;;  %2837 = vmatpush3.bf16.msra.mxu1 %v2836_v45  ;;  %v1439_v41 = vld [vmem:[#allocation3 + $0x680] sm:$0xff]  ;;  %v1151_v45 = vld [vmem:[#allocation2 + $0xa] sm:$0x1] }
  0xbb   :  { %2838 = vmatprep.subr.bf16.mxu0 %v3040_v0  ;;  %2862 = vmatprep.subr.bf16.mxu1 %v3040_v0  ;;  %v1173_v37 = vsel %vm243_vm1, %v1172_v32, %v1151_v45  ;;  %v2911_v48 = vpack.c.bf16 %v1440_v47, %v1439_v41  ;;  %v1629_v32 = vld [vmem:[#allocation3 + $0x780] sm:$0xff]  ;;  %v1537_v47 = vld [vmem:[#allocation3 + $0x718] sm:$0xff] }
  0xbc   :  { %v2959_v45 = vpack.c.bf16 %v1630_v34, %v1629_v32 }
  0xbd   :  { %2351 = vmatmul.mubr.f32.vlgmr.msra.gmra.mrb[8].mxu0 %v983_v50  ;;  %2386 = vmatmul.mubr.f32.vlgmr.msra.gmra.mrb[8].mxu1 %v1078_v51  ;;  %v1442_v50 = vld [vmem:[#allocation3 + $0x698] sm:$0xff]  ;;  %v2890_v51 = vpack.c.bf16 %v1347_v49, %v1346_v38  ;;  %v1538_v38 = vld [vmem:[#allocation3 + $0x720] sm:$0xff]  ;;  %v1539_v49 = vld [vmem:[#allocation3 + $0x728] sm:$0xff] }
  0xbe   :  { %2840 = vmatpush3.bf16.msra.mxu0 %v2839_v43  ;;  %2864 = vmatpush3.bf16.msra.mxu1 %v2863_v44  ;;  %v1441_v43 = vld [vmem:[#allocation3 + $0x690] sm:$0xff] }
  0xbf   :  { %2841 = vmatprep.subr.bf16.mxu0 %v3040_v0  ;;  %2865 = vmatprep.subr.bf16.mxu1 %v3040_v0  ;;  %v2914_v44 = vpack.c.bf16 %v1442_v50, %v1441_v43  ;;  %v1633_v43 = vld [vmem:[#allocation3 + $0x7a0] sm:$0xff]  ;;  %v1634_v50 = vld [vmem:[#allocation3 + $0x7a8] sm:$0xff] }
  0xc0   :  { %2420 = vmatprep.mubr.msk.f32.mxu0 %vm3041_vm0, %v3042_v1  ;;  %2455 = vmatprep.mubr.msk.f32.mxu1 %vm3041_vm0, %v3042_v1 }
  0xc2   :  { %2843 = vmatpush3.bf16.msra.mxu0 %v2842_v56  ;;  %2867 = vmatpush3.bf16.msra.mxu1 %v2866_v57  ;;  %v2893_v56 = vpack.c.bf16 %v1349_v53, %v1348_v52  ;;  %v2917_v57 = vpack.c.bf16 %v1444_v55, %v1443_v54  ;;  %v1540_v52 = vld [vmem:[#allocation3 + $0x730] sm:$0xff]  ;;  %v1541_v53 = vld [vmem:[#allocation3 + $0x738] sm:$0xff] }
  0xc3   :  { %2844 = vmatprep.subr.bf16.mxu0 %v3040_v0  ;;  %2868 = vmatprep.subr.bf16.mxu1 %v3040_v0  ;;  %v1635_v54 = vld [vmem:[#allocation3 + $0x7b0] sm:$0xff]  ;;  %v1636_v55 = vld [vmem:[#allocation3 + $0x7b8] sm:$0xff] }
  0xc6   :  { %2846 = vmatpush3.bf16.msra.mxu0 %v2845_v2  ;;  %2870 = vmatpush3.bf16.msra.mxu1 %v2869_v8  ;;  %v2896_v2 = vpack.c.bf16 %v1351_v62, %v1350_v58  ;;  %v2920_v8 = vpack.c.bf16 %v1446_v63, %v1445_v59  ;;  %v1542_v58 = vld [vmem:[#allocation3 + $0x740] sm:$0xff]  ;;  %v1638_v59 = vld [vmem:[#allocation3 + $0x7c8] sm:$0xff] }
  0xc7   :  { %2847 = vmatprep.subr.bf16.mxu0 %v3040_v0  ;;  %2871 = vmatprep.subr.bf16.mxu1 %v3040_v0  ;;  %v1637_v62 = vld [vmem:[#allocation3 + $0x7c0] sm:$0xff] }
  0xca   :  { %2849 = vmatpush3.bf16.msra.mxu0 %v2848_v6  ;;  %2873 = vmatpush3.bf16.msra.mxu1 %v2872_v7  ;;  %v2899_v6 = vpack.c.bf16 %v1353_v4, %v1352_v3  ;;  %v2923_v7 = vpack.c.bf16 %v1448_v15, %v1447_v5  ;;  %v1545_v3 = vld [vmem:[#allocation3 + $0x758] sm:$0xff]  ;;  %v1639_v4 = vld [vmem:[#allocation3 + $0x7d0] sm:$0xff] }
  0xcb   :  { %2850 = vmatprep.subr.bf16.mxu0 %v3040_v0  ;;  %2874 = vmatprep.subr.bf16.mxu1 %v3040_v0  ;;  %v1640_v5 = vld [vmem:[#allocation3 + $0x7d8] sm:$0xff] }
  0xce   :  { %2852 = vmatpush3.bf16.msra.mxu0 %v2851_v14  ;;  %2876 = vmatpush3.bf16.msra.mxu1 %v2875_v60  ;;  %v2902_v14 = vpack.c.bf16 %v1355_v11, %v1354_v10  ;;  %v2926_v60 = vpack.c.bf16 %v1450_v13, %v1449_v12  ;;  %v1547_v10 = vld [vmem:[#allocation3 + $0x768] sm:$0xff]  ;;  %v1641_v11 = vld [vmem:[#allocation3 + $0x7e0] sm:$0xff] }
  0xcf   :  { %2853 = vmatprep.subr.bf16.mxu0 %v3040_v0  ;;  %2877 = vmatprep.subr.bf16.mxu1 %v3040_v0  ;;  %v1642_v12 = vld [vmem:[#allocation3 + $0x7e8] sm:$0xff] }
  0xd2   :  { %2855 = vmatpush3.bf16.msra.mxu0 %v2854_v18  ;;  %2879 = vmatpush3.bf16.msra.mxu1 %v2878_v19  ;;  %v2905_v18 = vpack.c.bf16 %v1357_v9, %v1356_v61  ;;  %v2929_v19 = vpack.c.bf16 %v1452_v17, %v1451_v16  ;;  %v2977_v17 = vpack.c.bf16 %v1642_v12, %v1641_v11  ;;  %v1765_v11 = vld [vmem:[%s3450_s4] ss:$0 sm:$0xff] }
  0xd3   :  { %2856 = vmatprep.subr.bf16.mxu0 %v3040_v0  ;;  %2880 = vmatprep.subr.bf16.mxu1 %v3040_v0 }
  0xd6   :  { %2858 = vmatpush3.bf16.msra.mxu0 %v2857_v33  ;;  %2882 = vmatpush3.bf16.msra.mxu1 %v2881_v24  ;;  %v1454_v33 = vld [vmem:[#allocation3 + $0x6f8] sm:$0xff] }
  0xd7   :  { %2859 = vmatprep.subr.bf16.mxu0 %v3040_v0  ;;  %2883 = vmatprep.subr.bf16.mxu1 %v3040_v0  ;;  %v1437_v24 = vld [vmem:[#allocation2 + $0x1d] sm:$0x1]  ;;  %v2932_v26 = vpack.c.bf16 %v1454_v33, %v1453_v23  ;;  %v1627_v23 = vld [vmem:[#allocation2 + $0x1f] sm:$0x1] }
  0xda   :  { %2861 = vmatpush3.bf16.msra.mxu0 %v2860_v30  ;;  %2885 = vmatpush3.bf16.msra.mxu1 %v2884_v31  ;;  %v1457_v30 = vrot.slane %v1437_v24, 7  ;;  %v1436_v31 = vld [vmem:[#allocation2 + $0xd] sm:$0x1]  ;;  %v2980_v24 = vpack.c.bf16 %v1644_v21, %v1643_v20 }
  0xdb   :  { %2886 = vmatprep.subr.bf16.mxu0 %v3040_v0  ;;  %2910 = vmatprep.subr.bf16.mxu1 %v3040_v0 }
  0xdc   :  { %v1458_v41 = vsel %vm243_vm1, %v1457_v30, %v1436_v31 }
  0xdd   :  { %2421 = vmatmul.mubr.f32.vlgmr.msra.gmra.mrb[10].mxu0 %v1173_v37  ;;  %2456 = vmatmul.mubr.f32.vlgmr.msra.gmra.mrb[10].mxu1 %v1268_v42  ;;  %v1632_v37 = vld [vmem:[#allocation3 + $0x798] sm:$0xff]  ;;  %v2938_v42 = vpack.c.bf16 %v1537_v47, %v1536_v46 }
  0xde   :  { %2888 = vmatpush3.bf16.msra.mxu0 %v2887_v36  ;;  %2912 = vmatpush3.bf16.msra.mxu1 %v2911_v48  ;;  %v1631_v36 = vld [vmem:[#allocation3 + $0x790] sm:$0xff] }
  0xdf   :  { %2889 = vmatprep.subr.bf16.mxu0 %v3040_v0  ;;  %2913 = vmatprep.subr.bf16.mxu1 %v3040_v0  ;;  %v2962_v48 = vpack.c.bf16 %v1632_v37, %v1631_v36 }
  0xe0   :  { %2490 = vmatprep.mubr.msk.f32.mxu0 %vm3041_vm0, %v3042_v1  ;;  %2525 = vmatprep.mubr.msk.f32.mxu1 %vm3041_vm0, %v3042_v1 }
  0xe2   :  { %2891 = vmatpush3.bf16.msra.mxu0 %v2890_v51  ;;  %2915 = vmatpush3.bf16.msra.mxu1 %v2914_v44  ;;  %v2941_v51 = vpack.c.bf16 %v1539_v49, %v1538_v38  ;;  %v2965_v44 = vpack.c.bf16 %v1634_v50, %v1633_v43 }
  0xe3   :  { %2892 = vmatprep.subr.bf16.mxu0 %v3040_v0  ;;  %2916 = vmatprep.subr.bf16.mxu1 %v3040_v0 }
  0xe6   :  { %2894 = vmatpush3.bf16.msra.mxu0 %v2893_v56  ;;  %2918 = vmatpush3.bf16.msra.mxu1 %v2917_v57  ;;  %v2944_v56 = vpack.c.bf16 %v1541_v53, %v1540_v52  ;;  %v2968_v57 = vpack.c.bf16 %v1636_v55, %v1635_v54 }
  0xe7   :  { %2895 = vmatprep.subr.bf16.mxu0 %v3040_v0  ;;  %2919 = vmatprep.subr.bf16.mxu1 %v3040_v0 }
  0xea   :  { %2897 = vmatpush3.bf16.msra.mxu0 %v2896_v2  ;;  %2921 = vmatpush3.bf16.msra.mxu1 %v2920_v8  ;;  %v2971_v2 = vpack.c.bf16 %v1638_v59, %v1637_v62  ;;  %v1544_v8 = vld [vmem:[#allocation3 + $0x750] sm:$0xff] }
  0xeb   :  { %2898 = vmatprep.subr.bf16.mxu0 %v3040_v0  ;;  %2922 = vmatprep.subr.bf16.mxu1 %v3040_v0  ;;  %v2950_v15 = vpack.c.bf16 %v1545_v3, %v1544_v8 }
  0xee   :  { %2900 = vmatpush3.bf16.msra.mxu0 %v2899_v6  ;;  %2924 = vmatpush3.bf16.msra.mxu1 %v2923_v7  ;;  %v2974_v6 = vpack.c.bf16 %v1640_v5, %v1639_v4  ;;  %v1546_v7 = vld [vmem:[#allocation3 + $0x760] sm:$0xff] }
  0xef   :  { %2901 = vmatprep.subr.bf16.mxu0 %v3040_v0  ;;  %2925 = vmatprep.subr.bf16.mxu1 %v3040_v0  ;;  %v2953_v16 = vpack.c.bf16 %v1547_v10, %v1546_v7 }
  0xf2   :  { %2903 = vmatpush3.bf16.msra.mxu0 %v2902_v14  ;;  %2927 = vmatpush3.bf16.msra.mxu1 %v2926_v60 }
  0xf3   :  { %2904 = vmatprep.subr.bf16.mxu0 %v3040_v0  ;;  %2928 = vmatprep.subr.bf16.mxu1 %v3040_v0 }
  0xf6   :  { %2906 = vmatpush3.bf16.msra.mxu0 %v2905_v18  ;;  %2930 = vmatpush3.bf16.msra.mxu1 %v2929_v19  ;;  %v1548_v18 = vld [vmem:[#allocation3 + $0x770] sm:$0xff]  ;;  %v1549_v19 = vld [vmem:[#allocation3 + $0x778] sm:$0xff] }
  0xf7   :  { %2907 = vmatprep.subr.bf16.mxu0 %v3040_v0  ;;  %2931 = vmatprep.subr.bf16.mxu1 %v3040_v0  ;;  %v2956_v33 = vpack.c.bf16 %v1549_v19, %v1548_v18 }
  0xfa   :  { %2909 = vmatpush3.bf16.msra.mxu0 %v2908_v25  ;;  %2933 = vmatpush3.bf16.msra.mxu1 %v2932_v26  ;;  %v1647_v25 = vrot.slane %v1627_v23, 7  ;;  %v1531_v26 = vld [vmem:[#allocation2 + $0xe] sm:$0x1] }
  0xfb   :  { %2934 = vmatprep.subr.bf16.mxu0 %v3040_v0  ;;  %2958 = vmatprep.subr.bf16.mxu1 %v3040_v0  ;;  %v1553_v28 = vsel %vm243_vm1, %v1552_v35, %v1531_v26 }
  0xfc   :  { %v1648_v29 = vsel %vm243_vm1, %v1647_v25, %v1626_v27 }
  0xfd   :  { %2491 = vmatmul.mubr.f32.vlgmr.msra.gmra.mrb[12].mxu0 %v1363_v39  ;;  %2526 = vmatmul.mubr.f32.vlgmr.msra.gmra.mrb[12].mxu1 %v1458_v41 }
  0xfe   :  { %2936 = vmatpush3.bf16.msra.mxu0 %v2935_v40  ;;  %2960 = vmatpush3.bf16.msra.mxu1 %v2959_v45 }
  0xff   :  { %2937 = vmatprep.subr.bf16.mxu0 %v3040_v0  ;;  %2961 = vmatprep.subr.bf16.mxu1 %v3040_v0 }
 0x100   :  { %2560 = vmatprep.mubr.msk.f32.mxu0 %vm3041_vm0, %v3042_v1  ;;  %2595 = vmatprep.mubr.msk.f32.mxu1 %vm3041_vm0, %v3042_v1  ;;  %v1543_v1 = vld [vmem:[#allocation3 + $0x748] sm:$0xff] }
 0x101   :  { %v2947_v63 = vpack.c.bf16 %v1543_v1, %v1542_v58 }
 0x102   :  { %2939 = vmatpush3.bf16.msra.mxu0 %v2938_v42  ;;  %2963 = vmatpush3.bf16.msra.mxu1 %v2962_v48 }
 0x103   :  { %2940 = vmatprep.subr.bf16.mxu0 %v3040_v0  ;;  %2964 = vmatprep.subr.bf16.mxu1 %v3040_v0 }
 0x106   :  { %2942 = vmatpush3.bf16.msra.mxu0 %v2941_v51  ;;  %2966 = vmatpush3.bf16.msra.mxu1 %v2965_v44 }
 0x107   :  { %2943 = vmatprep.subr.bf16.mxu0 %v3040_v0  ;;  %2967 = vmatprep.subr.bf16.mxu1 %v3040_v0 }
 0x10a   :  { %2945 = vmatpush3.bf16.msra.mxu0 %v2944_v56  ;;  %2969 = vmatpush3.bf16.msra.mxu1 %v2968_v57 }
 0x10b   :  { %2946 = vmatprep.subr.bf16.mxu0 %v3040_v0  ;;  %2970 = vmatprep.subr.bf16.mxu1 %v3040_v0 }
 0x10e   :  { %2948 = vmatpush3.bf16.msra.mxu0 %v2947_v63  ;;  %2972 = vmatpush3.bf16.msra.mxu1 %v2971_v2 }
 0x10f   :  { %2949 = vmatprep.subr.bf16.mxu0 %v3040_v0  ;;  %2973 = vmatprep.subr.bf16.mxu1 %v3040_v0 }
 0x110   :  { %v312_v13 = vpop.f32.mrb[0].mxu0  ;;  %v387_v14 = vpop.f32.mrb[0].mxu1 }
 0x111   :  { %v2072_v60 = vpop.f32.mrb[1].mxu0  ;;  %v388_v61 = vadd.f32 %v387_v14, %v312_v13  ;;  %v2107_v9 = vpop.f32.mrb[1].mxu1 }
 0x112   :  { %2951 = vmatpush3.bf16.msra.mxu0 %v2950_v15  ;;  %2975 = vmatpush3.bf16.msra.mxu1 %v2974_v6 }
 0x113   :  { %2952 = vmatprep.subr.bf16.mxu0 %v3040_v0  ;;  %2976 = vmatprep.subr.bf16.mxu1 %v3040_v0 }
 0x116   :  { %2954 = vmatpush3.bf16.msra.mxu0 %v2953_v16  ;;  %2978 = vmatpush3.bf16.msra.mxu1 %v2977_v17 }
 0x117   :  { %2955 = vmatprep.subr.bf16.mxu0 %v3040_v0  ;;  %2979 = vmatprep.subr.bf16.mxu1 %v3040_v0 }
 0x11a   :  { %2957 = vmatpush3.bf16.msra.mxu0 %v2956_v33  ;;  %2981 = vmatpush3.bf16.msra.mxu1 %v2980_v24 }
 0x11d   :  { %2561 = vmatmul.mubr.f32.vlgmr.msra.gmra.mrb[14].mxu0 %v1553_v28  ;;  %2596 = vmatmul.mubr.f32.vlgmr.msra.gmra.mrb[14].mxu1 %v1648_v29 }
 0x130   :  { %v481_v30 = vpop.f32.mrb[2].mxu0  ;;  %v576_v31 = vpop.f32.mrb[2].mxu1 }
 0x131   :  { %v485_v32 = vadd.f32 %v481_v30, %v388_v61  ;;  %v2142_v34 = vpop.f32.mrb[3].mxu0  ;;  %v2177_v39 = vpop.f32.mrb[3].mxu1 }
 0x133   :  { %v580_v40 = vadd.f32 %v576_v31, %v485_v32 }
 0x150   :  { %v671_v41 = vpop.f32.mrb[4].mxu0  ;;  %v766_v45 = vpop.f32.mrb[4].mxu1 }
 0x151   :  { %v675_v46 = vadd.f32 %v671_v41, %v580_v40  ;;  %v2212_v0 = vpop.f32.mrb[5].mxu0  ;;  %v2247_v47 = vpop.f32.mrb[5].mxu1 }
 0x153   :  { %v770_v36 = vadd.f32 %v766_v45, %v675_v46 }
 0x170   :  { %v861_v37 = vpop.f32.mrb[6].mxu0  ;;  %v956_v42 = vpop.f32.mrb[6].mxu1 }
 0x171   :  { %v865_v48 = vadd.f32 %v861_v37, %v770_v36  ;;  %v2282_v38 = vpop.f32.mrb[7].mxu0  ;;  %v2317_v49 = vpop.f32.mrb[7].mxu1 }
 0x173   :  { %v960_v43 = vadd.f32 %v956_v42, %v865_v48 }
 0x190   :  { %v1051_v50 = vpop.f32.mrb[8].mxu0  ;;  %v1146_v51 = vpop.f32.mrb[8].mxu1 }
 0x191   :  { %v1055_v44 = vadd.f32 %v1051_v50, %v960_v43  ;;  %v2352_v52 = vpop.f32.mrb[9].mxu0  ;;  %v2387_v53 = vpop.f32.mrb[9].mxu1 }
 0x193   :  { %v1150_v54 = vadd.f32 %v1146_v51, %v1055_v44 }
 0x1b0   :  { %v1241_v55 = vpop.f32.mrb[10].mxu0  ;;  %v1336_v56 = vpop.f32.mrb[10].mxu1 }
 0x1b1   :  { %v1245_v57 = vadd.f32 %v1241_v55, %v1150_v54  ;;  %v2422_v58 = vpop.f32.mrb[11].mxu0  ;;  %v2457_v1 = vpop.f32.mrb[11].mxu1 }
 0x1b3   :  { %v1340_v62 = vadd.f32 %v1336_v56, %v1245_v57 }
 0x1d0   :  { %v1431_v59 = vpop.f32.mrb[12].mxu0  ;;  %v1526_v63 = vpop.f32.mrb[12].mxu1 }
 0x1d1   :  { %v1435_v2 = vadd.f32 %v1431_v59, %v1340_v62  ;;  %v2492_v8 = vpop.f32.mrb[13].mxu0  ;;  %v2527_v3 = vpop.f32.mrb[13].mxu1 }
 0x1d3   :  { %v1530_v4 = vadd.f32 %v1526_v63, %v1435_v2 }
 0x1f0   :  { %v1621_v5 = vpop.f32.mrb[14].mxu0  ;;  %v1716_v15 = vpop.f32.mrb[14].mxu1 }
 0x1f1   :  { %v1625_v6 = vadd.f32 %v1621_v5, %v1530_v4  ;;  %v2562_v7 = vpop.f32.mrb[15].mxu0  ;;  %v2597_v10 = vpop.f32.mrb[15].mxu1 }
 0x1f3   :  { %v1720_v12 = vadd.f32 %v1716_v15, %v1625_v6 }
 0x1f5   :  { %v1728_v13 = vadd.f32 %v1765_v11, %v1720_v12 }
 0x1f7   :  { %1729 = vst [vmem:[#allocation6] sm:$0x3] %v1728_v13 }
 0x1f8   :  { %3022 = shalt.err (!%p3019_p12)
}
 0x1f9   :  { %s3023_s3 = scalar_lea.hbm %s3451_s5, 32 }
 0x1fa   :  { %p3024_p13 = scmp.ne.s32.totalorder %s3451_s5, %s3023_s3  ;;  %p3027_p0 = scmp.lt.u32.totalorder %s3023_s3, %s3451_s5 }
 0x1fc   :  { %p3029_p1 = pnand %p3027_p0, %p3024_p13 }
 0x1fe   :  { %3032 = shalt.err (!%p3029_p1)
}
 0x1ff   :  { %1739 = dma.vmem_to_hbm [thread:$0]  %s1737_s28, 32, %s3451_s5, [#allocation5]  }
 0x200   :  { %3035 = dma.done.wait [#allocation5], 32  }
 0x201   :  { %3036 = vsyncadd [#allocation5], 4294967264 }
 0x202   :  { %1743 = vsyncpa [#allocation4], 1 }
 0x203   :  { %1744 = vsyncpa [#allocation5], 1 }

</bundles_post_ra>
